<compile_context>
chip_gen: v7x
topology: tpu7x:2x2x1
jax: 0.10.0
libtpu: 0.0.40
codegen_flags: <defaults>
</compile_context>

<pallas_src>
import functools
import numpy as np
import jax
import jax.numpy as jnp
from jax.experimental import pallas as pl
from jax.experimental.pallas import tpu as pltpu

# ----------------------------- configuration --------------------------------
B = 2            # batch
L = 1024         # raw-audio samples
SR = 16000       # sample rate (Hz)
WIN = 256        # window / n_fft
HOP = 128        # hop length (== TPU lane width)
NFFT = 256
NF = NFFT // 2 + 1               # 129 physical freq bins
NFP = 128                        # kept bins: Nyquist dropped (zero mel row)
NROWS = L // HOP                 # 8 lane-rows of the reshaped signal
T_FRAMES = (L - WIN) // HOP + 1  # 7 frames
NMEL = 32        # mel bins
C = 32           # TDNN channels
ATT = 16         # attention bottleneck
EMB = 48         # embedding dim
NCLS = 10        # speaker classes
OUT_W = 128      # lane-dense packed output width (logits | emb | zero pad)
PREEMPH = 0.97
LOG_GUARD = 2.0 ** -24
CONV_CFG = ((5, 1), (3, 2), (3, 3))      # (kernel, dilation) per TDNN layer


# ----------------------------- fused Pallas kernel ---------------------------
def _fused_fwd_kernel(x_ref, wdft_ref, mel_ref,
                      w1_ref, b1_ref, w2_ref, b2_ref, w3_ref, b3_ref,
                      wa1_ref, ba1_ref, wa2_ref, ba2_ref,
                      wemb_ref, bemb_ref, wcls_ref, bcls_ref,
                      out_ref):
    bsz = x_ref.shape[0]

    # ---- framing in registers: frame t = rows [t, t+1] of the (NROWS,HOP) signal ----
    frames = []
    for b in range(bsz):
        xb = x_ref[b]                                                # (NROWS, HOP) bf16
        frames.append(jnp.concatenate(
            [xb[0:T_FRAMES, :], xb[1:T_FRAMES + 1, :]], axis=1))     # (T, WIN)
    fr = jnp.concatenate(frames, axis=0)                             # (B*T, WIN)

    # ---- log-mel frontend, batched over the whole batch ----
    spec = jnp.dot(fr, wdft_ref[...],
                   preferred_element_type=jnp.float32)               # (B*T, 2*NFP)
    re = spec[:, :NFP]
    im = spec[:, NFP:]
    power = re * re + im * im                                        # (B*T, NFP)
    mel = jnp.dot(power.astype(mel_ref.dtype), mel_ref[...],
                  preferred_element_type=jnp.float32)                # (B*T, NMEL)
    logm = jnp.log(mel + LOG_GUARD)

    def conv(xin, w_ref, b_ref, k, dil):
        # dilated 'same' conv as ONE im2col matmul, fully in registers
        pad = dil * (k - 1) // 2
        cin = xin.shape[1]
        zpad = jnp.zeros((pad, cin), xin.dtype)
        xp = jnp.concatenate([zpad, xin, zpad], axis=0)              # (T+2p, Cin)
        cols = [xp[kk * dil: kk * dil + T_FRAMES, :] for kk in range(k)]
        xcol = jnp.concatenate(cols, axis=1)                         # (T, K*Cin)
        acc = jnp.dot(xcol.astype(w_ref.dtype), w_ref[...],
                      preferred_element_type=jnp.float32)            # (T, Cout)
        return jnp.maximum(acc + b_ref[...], 0.0)

    rows = []
    for b in range(bsz):
        lm = logm[b * T_FRAMES:(b + 1) * T_FRAMES, :]                # (T, NMEL)
        # NeMo "per_feature" normalization over time (unbiased variance).
        mean = jnp.mean(lm, axis=0, keepdims=True)
        var = jnp.sum((lm - mean) ** 2, axis=0, keepdims=True) / (T_FRAMES - 1)
        inv_std = pl.reciprocal(jnp.sqrt(var) + 1e-5, approx=True)   # EUP, not VPU divide
        x = (lm - mean) * inv_std                                    # (T, NMEL)
        # TODO(synk): NeMo also masks frames past each example's valid length;
        # all examples here are full-length so masking is omitted.

        # ---- dilated TDNN convs ----
        h = conv(x, w1_ref, b1_ref, *CONV_CFG[0])
        h = conv(h, w2_ref, b2_ref, *CONV_CFG[1])
        h = conv(h, w3_ref, b3_ref, *CONV_CFG[2])                    # (T, C)

        # ---- attentive statistics pooling (softmax over time, per channel) ----
        a = jnp.tanh(jnp.dot(h.astype(wa1_ref.dtype), wa1_ref[...],
                             preferred_element_type=jnp.float32) + ba1_ref[...])
        s = jnp.dot(a.astype(wa2_ref.dtype), wa2_ref[...],
                    preferred_element_type=jnp.float32) + ba2_ref[...]   # (T, C)
        s = s - jnp.max(s, axis=0, keepdims=True)
        e = jnp.exp(s)
        alpha = e * pl.reciprocal(jnp.sum(e, axis=0, keepdims=True), approx=True)
        mu = jnp.sum(alpha * h, axis=0, keepdims=True)               # (1, C)
        var_p = jnp.sum(alpha * h * h, axis=0, keepdims=True) - mu * mu
        sg = jnp.sqrt(jnp.maximum(var_p, 1e-8))                      # (1, C)

        # ---- embedding head + classifier (fused [mu, sg] matmul) ----
        pooled = jnp.concatenate([mu, sg], axis=1)                   # (1, 2C)
        emb = jnp.dot(pooled.astype(wemb_ref.dtype), wemb_ref[...],
                      preferred_element_type=jnp.float32) + bemb_ref[...]   # (1, EMB)
        logits = jnp.dot(emb.astype(wcls_ref.dtype), wcls_ref[...],
                         preferred_element_type=jnp.float32) + bcls_ref[...]  # (1, NCLS)

        rows.append(jnp.concatenate(
            [logits, emb, jnp.zeros((1, OUT_W - NCLS - EMB), jnp.float32)], axis=1))

    # single lane-dense store of the packed (B, 128) result slab
    out_ref[...] = jnp.concatenate(rows, axis=0)


def ecapa_fused(x2d, w):
    bsz = x2d.shape[0]
    weights = [w["wdft"], w["melfb"],
               w["w1"], w["b1"], w["w2"], w["b2"], w["w3"], w["b3"],
               w["wa1"], w["ba1"], w["wa2"], w["ba2"],
               w["wemb"], w["bemb"], w["wcls"], w["bcls"]]

    def full_spec(a):
        return pl.BlockSpec(a.shape, lambda i, n=a.ndim: (0,) * n)

    packed = pl.pallas_call(
        _fused_fwd_kernel,
        out_shape=jax.ShapeDtypeStruct((bsz, OUT_W), jnp.float32),
        grid=(1,),
        in_specs=[full_spec(x2d)] + [full_spec(a) for a in weights],
        out_specs=pl.BlockSpec((bsz, OUT_W), lambda i: (0, 0)),
        compiler_params=pltpu.CompilerParams(
            dimension_semantics=("arbitrary",)),
    )(x2d, *weights)
    return packed[:, :NCLS], packed[:, NCLS:NCLS + EMB]


# ----------------------------- frontend constants ----------------------------
def _mel_filterbank(n_mels, n_fft, sr):
    def hz_to_mel(f): return 2595.0 * np.log10(1.0 + f / 700.0)
    def mel_to_hz(m): return 700.0 * (10.0 ** (m / 2595.0) - 1.0)
    nf = n_fft // 2 + 1
    mels = np.linspace(hz_to_mel(0.0), hz_to_mel(sr / 2.0), n_mels + 2)
    bins = np.floor((n_fft + 1) * mel_to_hz(mels) / sr).astype(int)
    fb = np.zeros((nf, n_mels), dtype=np.float32)
    for m in range(1, n_mels + 1):
        lo, ce, hi = bins[m - 1], bins[m], bins[m + 1]
        for kk in range(lo, ce):
            if ce > lo:
                fb[kk, m - 1] = (kk - lo) / (ce - lo)
        for kk in range(ce, hi):
            if hi > ce:
                fb[kk, m - 1] = (hi - kk) / (hi - ce)
    return fb


def _dft_matrices():
    n = np.arange(WIN)
    f = np.arange(NF)
    hann = 0.5 - 0.5 * np.cos(2.0 * np.pi * n / WIN)
    ang = 2.0 * np.pi * np.outer(n, f) / NFFT
    wcos = (hann[:, None] * np.cos(ang)).astype(np.float32)
    wsin = (-hann[:, None] * np.sin(ang)).astype(np.float32)
    return wcos, wsin


# ----------------------------- parameters ------------------------------------
def init_params(key):
    ks = jax.random.split(key, 14)
    sc = 0.1
    return {
        # TDNN encoder (simplified ECAPA: conv(k5,d1) -> conv(k3,d2) -> conv(k3,d3))
        "w_c1": sc * jax.random.normal(ks[0], (C, NMEL, 5), jnp.float32),
        "b_c1": sc * jax.random.normal(ks[1], (C,), jnp.float32),
        "w_c2": sc * jax.random.normal(ks[2], (C, C, 3), jnp.float32),
        "b_c2": sc * jax.random.normal(ks[3], (C,), jnp.float32),
        "w_c3": sc * jax.random.normal(ks[4], (C, C, 3), jnp.float32),
        "b_c3": sc * jax.random.normal(ks[5], (C,), jnp.float32),
        # attentive statistics pooling
        "w_a1": sc * jax.random.normal(ks[6], (ATT, C), jnp.float32),
        "b_a1": sc * jax.random.normal(ks[7], (ATT,), jnp.float32),
        "w_a2": sc * jax.random.normal(ks[8], (C, ATT), jnp.float32),
        "b_a2": sc * jax.random.normal(ks[9], (C,), jnp.float32),
        # embedding head + speaker classifier
        "w_emb": sc * jax.random.normal(ks[10], (EMB, 2 * C), jnp.float32),
        "b_emb": sc * jax.random.normal(ks[11], (EMB,), jnp.float32),
        "w_cls": sc * jax.random.normal(ks[12], (NCLS, EMB), jnp.float32),
        "b_cls": sc * jax.random.normal(ks[13], (NCLS,), jnp.float32),
    }


def prep_weights(raw):
    """One-time re-layout of weights into the fused-kernel (time-major) layouts."""
    wcos, wsin = _dft_matrices()                      # (WIN, NF)
    melfb = _mel_filterbank(NMEL, NFFT, SR)           # (NF, NMEL)
    # Dropping the Nyquist bin is exact: its mel-filterbank row is all zero.
    assert np.all(melfb[NFP:, :] == 0.0)
    wdft = np.concatenate([wcos[:, :NFP], wsin[:, :NFP]], axis=1)   # (WIN, 2*NFP)
    mel_p = melfb[:NFP, :]                                          # (NFP, NMEL)

    bf = jnp.bfloat16

    def conv_w(w):   # (Cout, Cin, K) -> (K*Cin, Cout) im2col layout
        return jnp.transpose(w, (2, 1, 0)).reshape(-1, w.shape[0]).astype(bf)

    return {
        "wdft": jnp.asarray(wdft, bf), "melfb": jnp.asarray(mel_p, bf),
        "w1": conv_w(raw["w_c1"]), "b1": raw["b_c1"].reshape(1, C),
        "w2": conv_w(raw["w_c2"]), "b2": raw["b_c2"].reshape(1, C),
        "w3": conv_w(raw["w_c3"]), "b3": raw["b_c3"].reshape(1, C),
        "wa1": raw["w_a1"].T.astype(bf), "ba1": raw["b_a1"].reshape(1, ATT),
        "wa2": raw["w_a2"].T.astype(bf), "ba2": raw["b_a2"].reshape(1, C),
        "wemb": raw["w_emb"].T.astype(bf), "bemb": raw["b_emb"].reshape(1, EMB),
        "wcls": raw["w_cls"].T.astype(bf), "bcls": raw["b_cls"].reshape(1, NCLS),
    }


# ----------------------------- forward ---------------------------------------
def ecapa_forward(weights, input_signal, input_signal_length):
    # Pre-emphasis is one tiny elementwise XLA op; framing happens in-kernel
    # (HOP == lane width, WIN == 2*HOP -> frame t = rows [t, t+1]).
    x = input_signal.astype(jnp.float32)
    x = jnp.concatenate([x[:, :1], x[:, 1:] - PREEMPH * x[:, :-1]], axis=1)
    x2d = x.reshape(x.shape[0], NROWS, HOP).astype(jnp.bfloat16)
    del input_signal_length  # TODO(synk): no per-example length masking (full-length inputs only)

    logits, emb = ecapa_fused(x2d, weights)
    # NeMo EncDecSpeakerLabelModel returns (logits, embeddings)
    return logits, emb


# ----------------------------- main -------------------------------------------
if __name__ == "__main__":
    key = jax.random.PRNGKey(0)
    k_in, k_par = jax.random.split(key)
    input_signal = jax.random.normal(k_in, (B, L), jnp.float32)
    input_signal_length = jnp.full((B,), L, jnp.int32)
    weights = prep_weights(init_params(k_par))

    fwd = jax.jit(functools.partial(ecapa_forward, weights))
    logits, emb = fwd(input_signal, input_signal_length)
    jax.block_until_ready((logits, emb))

    assert logits.shape == (B, NCLS) and emb.shape == (B, EMB)
    assert bool(jnp.all(jnp.isfinite(logits))) and bool(jnp.all(jnp.isfinite(emb)))
    print("KERNEL_OK")
</pallas_src>

<mosaic_0001>
module attributes {stable_mosaic.version = 11 : i64} {
  func.func @_fused_fwd_kernel(%arg0: i32, %arg1: memref<2x8x128xbf16, #tpu.memory_space<vmem>>, %arg2: memref<256x256xbf16, #tpu.memory_space<vmem>>, %arg3: memref<128x32xbf16, #tpu.memory_space<vmem>>, %arg4: memref<160x32xbf16, #tpu.memory_space<vmem>>, %arg5: memref<1x32xf32, #tpu.memory_space<vmem>>, %arg6: memref<96x32xbf16, #tpu.memory_space<vmem>>, %arg7: memref<1x32xf32, #tpu.memory_space<vmem>>, %arg8: memref<96x32xbf16, #tpu.memory_space<vmem>>, %arg9: memref<1x32xf32, #tpu.memory_space<vmem>>, %arg10: memref<32x16xbf16, #tpu.memory_space<vmem>>, %arg11: memref<1x16xf32, #tpu.memory_space<vmem>>, %arg12: memref<16x32xbf16, #tpu.memory_space<vmem>>, %arg13: memref<1x32xf32, #tpu.memory_space<vmem>>, %arg14: memref<64x48xbf16, #tpu.memory_space<vmem>>, %arg15: memref<1x48xf32, #tpu.memory_space<vmem>>, %arg16: memref<48x10xbf16, #tpu.memory_space<vmem>>, %arg17: memref<1x10xf32, #tpu.memory_space<vmem>>, %arg18: memref<2x128xf32, #tpu.memory_space<vmem>>) attributes {dimension_semantics = [#tpu.dimension_semantics<arbitrary>], iteration_bounds = array<i64: 1>, scalar_prefetch = 0 : i64, scratch_operands = 0 : i64, tpu.core_type = #tpu.core_type<tc>, window_params = [{pipeline_mode = #tpu.pipeline_mode<synchronous>, transform_indices = @transform_0, window_bounds = array<i64: 2, 8, 128>}, {pipeline_mode = #tpu.pipeline_mode<synchronous>, transform_indices = @transform_1, window_bounds = array<i64: 256, 256>}, {pipeline_mode = #tpu.pipeline_mode<synchronous>, transform_indices = @transform_2, window_bounds = array<i64: 128, 32>}, {pipeline_mode = #tpu.pipeline_mode<synchronous>, transform_indices = @transform_3, window_bounds = array<i64: 160, 32>}, {pipeline_mode = #tpu.pipeline_mode<synchronous>, transform_indices = @transform_4, window_bounds = array<i64: 1, 32>}, {pipeline_mode = #tpu.pipeline_mode<synchronous>, transform_indices = @transform_5, window_bounds = array<i64: 96, 32>}, {pipeline_mode = #tpu.pipeline_mode<synchronous>, transform_indices = @transform_6, window_bounds = array<i64: 1, 32>}, {pipeline_mode = #tpu.pipeline_mode<synchronous>, transform_indices = @transform_7, window_bounds = array<i64: 96, 32>}, {pipeline_mode = #tpu.pipeline_mode<synchronous>, transform_indices = @transform_8, window_bounds = array<i64: 1, 32>}, {pipeline_mode = #tpu.pipeline_mode<synchronous>, transform_indices = @transform_9, window_bounds = array<i64: 32, 16>}, {pipeline_mode = #tpu.pipeline_mode<synchronous>, transform_indices = @transform_10, window_bounds = array<i64: 1, 16>}, {pipeline_mode = #tpu.pipeline_mode<synchronous>, transform_indices = @transform_11, window_bounds = array<i64: 16, 32>}, {pipeline_mode = #tpu.pipeline_mode<synchronous>, transform_indices = @transform_12, window_bounds = array<i64: 1, 32>}, {pipeline_mode = #tpu.pipeline_mode<synchronous>, transform_indices = @transform_13, window_bounds = array<i64: 64, 48>}, {pipeline_mode = #tpu.pipeline_mode<synchronous>, transform_indices = @transform_14, window_bounds = array<i64: 1, 48>}, {pipeline_mode = #tpu.pipeline_mode<synchronous>, transform_indices = @transform_15, window_bounds = array<i64: 48, 10>}, {pipeline_mode = #tpu.pipeline_mode<synchronous>, transform_indices = @transform_16, window_bounds = array<i64: 1, 10>}, {pipeline_mode = #tpu.pipeline_mode<synchronous>, transform_indices = @transform_17, window_bounds = array<i64: 2, 128>}]} {
    %c0 = arith.constant 0 : index
    %c0_0 = arith.constant 0 : index
    %c0_1 = arith.constant 0 : index
    %0 = vector.load %arg1[%c0, %c0_0, %c0_1] : memref<2x8x128xbf16, #tpu.memory_space<vmem>>, vector<1x8x128xbf16>
    %1 = vector.shape_cast %0 : vector<1x8x128xbf16> to vector<8x128xbf16>
    %2 = vector.extract_strided_slice %1 {offsets = [0, 0], sizes = [7, 128], strides = [1, 1]} : vector<8x128xbf16> to vector<7x128xbf16>
    %3 = vector.extract_strided_slice %1 {offsets = [1, 0], sizes = [7, 128], strides = [1, 1]} : vector<8x128xbf16> to vector<7x128xbf16>
    %4 = tpu.concatenate %2, %3 in 1 : vector<7x128xbf16>, vector<7x128xbf16> -> vector<7x256xbf16>
    %c1 = arith.constant 1 : index
    %c0_2 = arith.constant 0 : index
    %c0_3 = arith.constant 0 : index
    %5 = vector.load %arg1[%c1, %c0_2, %c0_3] : memref<2x8x128xbf16, #tpu.memory_space<vmem>>, vector<1x8x128xbf16>
    %6 = vector.shape_cast %5 : vector<1x8x128xbf16> to vector<8x128xbf16>
    %7 = vector.extract_strided_slice %6 {offsets = [0, 0], sizes = [7, 128], strides = [1, 1]} : vector<8x128xbf16> to vector<7x128xbf16>
    %8 = vector.extract_strided_slice %6 {offsets = [1, 0], sizes = [7, 128], strides = [1, 1]} : vector<8x128xbf16> to vector<7x128xbf16>
    %9 = tpu.concatenate %7, %8 in 1 : vector<7x128xbf16>, vector<7x128xbf16> -> vector<7x256xbf16>
    %10 = tpu.concatenate %4, %9 in 0 : vector<7x256xbf16>, vector<7x256xbf16> -> vector<14x256xbf16>
    %c0_4 = arith.constant 0 : index
    %c0_5 = arith.constant 0 : index
    %11 = vector.load %arg2[%c0_4, %c0_5] : memref<256x256xbf16, #tpu.memory_space<vmem>>, vector<256x256xbf16>
    %cst = arith.constant dense<0.000000e+00> : vector<14x256xf32>
    %12 = tpu.matmul %10, %11, %cst {dimension_numbers = #tpu.dot_dimension_numbers<[1], [0], [0], [1], [0, 0, 1, 1], [], []>} : vector<14x256xbf16>, vector<256x256xbf16>, vector<14x256xf32> -> vector<14x256xf32>
    %13 = vector.extract_strided_slice %12 {offsets = [0, 0], sizes = [14, 128], strides = [1, 1]} : vector<14x256xf32> to vector<14x128xf32>
    %14 = vector.extract_strided_slice %12 {offsets = [0, 128], sizes = [14, 128], strides = [1, 1]} : vector<14x256xf32> to vector<14x128xf32>
    %15 = arith.mulf %13, %13 : vector<14x128xf32>
    %16 = arith.mulf %14, %14 : vector<14x128xf32>
    %17 = arith.addf %15, %16 : vector<14x128xf32>
    %18 = arith.truncf %17 : vector<14x128xf32> to vector<14x128xbf16>
    %c0_6 = arith.constant 0 : index
    %c0_7 = arith.constant 0 : index
    %19 = vector.load %arg3[%c0_6, %c0_7] : memref<128x32xbf16, #tpu.memory_space<vmem>>, vector<128x32xbf16>
    %cst_8 = arith.constant dense<0.000000e+00> : vector<14x32xf32>
    %20 = tpu.matmul %18, %19, %cst_8 {dimension_numbers = #tpu.dot_dimension_numbers<[1], [0], [0], [1], [0, 0, 1, 1], [], []>} : vector<14x128xbf16>, vector<128x32xbf16>, vector<14x32xf32> -> vector<14x32xf32>
    %cst_9 = arith.constant 5.96046448E-8 : f32
    %21 = vector.broadcast %cst_9 : f32 to vector<14x32xf32>
    %22 = arith.addf %20, %21 : vector<14x32xf32>
    %23 = math.log %22 : vector<14x32xf32>
    %24 = vector.extract_strided_slice %23 {offsets = [0, 0], sizes = [7, 32], strides = [1, 1]} : vector<14x32xf32> to vector<7x32xf32>
    %cst_10 = arith.constant dense<0.000000e+00> : vector<32xf32>
    %25 = vector.multi_reduction <add>, %24, %cst_10 [0] : vector<7x32xf32> to vector<32xf32>
    %26 = vector.shape_cast %25 : vector<32xf32> to vector<1x32xf32>
    %cst_11 = arith.constant 7.000000e+00 : f32
    %27 = vector.broadcast %cst_11 : f32 to vector<1x32xf32>
    %28 = arith.divf %26, %27 : vector<1x32xf32>
    %29 = vector.broadcast %28 : vector<1x32xf32> to vector<7x32xf32>
    %30 = arith.subf %24, %29 : vector<7x32xf32>
    %31 = arith.mulf %30, %30 : vector<7x32xf32>
    %cst_12 = arith.constant dense<0.000000e+00> : vector<32xf32>
    %32 = vector.multi_reduction <add>, %31, %cst_12 [0] : vector<7x32xf32> to vector<32xf32>
    %33 = vector.shape_cast %32 : vector<32xf32> to vector<1x32xf32>
    %cst_13 = arith.constant 6.000000e+00 : f32
    %34 = vector.broadcast %cst_13 : f32 to vector<1x32xf32>
    %35 = arith.divf %33, %34 : vector<1x32xf32>
    %36 = math.sqrt %35 : vector<1x32xf32>
    %cst_14 = arith.constant 9.99999974E-6 : f32
    %37 = vector.broadcast %cst_14 : f32 to vector<1x32xf32>
    %38 = arith.addf %36, %37 : vector<1x32xf32>
    %39 = tpu.reciprocal %38 {approx = true} : vector<1x32xf32> -> vector<1x32xf32>
    %40 = vector.broadcast %28 : vector<1x32xf32> to vector<7x32xf32>
    %41 = arith.subf %24, %40 : vector<7x32xf32>
    %42 = vector.broadcast %39 : vector<1x32xf32> to vector<7x32xf32>
    %43 = arith.mulf %41, %42 : vector<7x32xf32>
    %cst_15 = arith.constant 0.000000e+00 : f32
    %44 = vector.broadcast %cst_15 : f32 to vector<2x32xf32>
    %45 = tpu.concatenate %44, %43, %44 in 0 : vector<2x32xf32>, vector<7x32xf32>, vector<2x32xf32> -> vector<11x32xf32>
    %46 = vector.extract_strided_slice %45 {offsets = [0, 0], sizes = [7, 32], strides = [1, 1]} : vector<11x32xf32> to vector<7x32xf32>
    %47 = vector.extract_strided_slice %45 {offsets = [1, 0], sizes = [7, 32], strides = [1, 1]} : vector<11x32xf32> to vector<7x32xf32>
    %48 = vector.extract_strided_slice %45 {offsets = [2, 0], sizes = [7, 32], strides = [1, 1]} : vector<11x32xf32> to vector<7x32xf32>
    %49 = vector.extract_strided_slice %45 {offsets = [3, 0], sizes = [7, 32], strides = [1, 1]} : vector<11x32xf32> to vector<7x32xf32>
    %50 = vector.extract_strided_slice %45 {offsets = [4, 0], sizes = [7, 32], strides = [1, 1]} : vector<11x32xf32> to vector<7x32xf32>
    %51 = tpu.concatenate %46, %47, %48, %49, %50 in 1 : vector<7x32xf32>, vector<7x32xf32>, vector<7x32xf32>, vector<7x32xf32>, vector<7x32xf32> -> vector<7x160xf32>
    %52 = arith.truncf %51 : vector<7x160xf32> to vector<7x160xbf16>
    %c0_16 = arith.constant 0 : index
    %c0_17 = arith.constant 0 : index
    %53 = vector.load %arg4[%c0_16, %c0_17] : memref<160x32xbf16, #tpu.memory_space<vmem>>, vector<160x32xbf16>
    %cst_18 = arith.constant dense<0.000000e+00> : vector<7x32xf32>
    %54 = tpu.matmul %52, %53, %cst_18 {dimension_numbers = #tpu.dot_dimension_numbers<[1], [0], [0], [1], [0, 0, 1, 1], [], []>} : vector<7x160xbf16>, vector<160x32xbf16>, vector<7x32xf32> -> vector<7x32xf32>
    %c0_19 = arith.constant 0 : index
    %c0_20 = arith.constant 0 : index
    %55 = vector.load %arg5[%c0_19, %c0_20] : memref<1x32xf32, #tpu.memory_space<vmem>>, vector<1x32xf32>
    %56 = vector.broadcast %55 : vector<1x32xf32> to vector<7x32xf32>
    %57 = arith.addf %54, %56 : vector<7x32xf32>
    %cst_21 = arith.constant 0.000000e+00 : f32
    %58 = vector.broadcast %cst_21 : f32 to vector<7x32xf32>
    %59 = arith.maximumf %57, %58 : vector<7x32xf32>
    %cst_22 = arith.constant 0.000000e+00 : f32
    %60 = vector.broadcast %cst_22 : f32 to vector<2x32xf32>
    %61 = tpu.concatenate %60, %59, %60 in 0 : vector<2x32xf32>, vector<7x32xf32>, vector<2x32xf32> -> vector<11x32xf32>
    %62 = vector.extract_strided_slice %61 {offsets = [0, 0], sizes = [7, 32], strides = [1, 1]} : vector<11x32xf32> to vector<7x32xf32>
    %63 = vector.extract_strided_slice %61 {offsets = [2, 0], sizes = [7, 32], strides = [1, 1]} : vector<11x32xf32> to vector<7x32xf32>
    %64 = vector.extract_strided_slice %61 {offsets = [4, 0], sizes = [7, 32], strides = [1, 1]} : vector<11x32xf32> to vector<7x32xf32>
    %65 = tpu.concatenate %62, %63, %64 in 1 : vector<7x32xf32>, vector<7x32xf32>, vector<7x32xf32> -> vector<7x96xf32>
    %66 = arith.truncf %65 : vector<7x96xf32> to vector<7x96xbf16>
    %c0_23 = arith.constant 0 : index
    %c0_24 = arith.constant 0 : index
    %67 = vector.load %arg6[%c0_23, %c0_24] : memref<96x32xbf16, #tpu.memory_space<vmem>>, vector<96x32xbf16>
    %cst_25 = arith.constant dense<0.000000e+00> : vector<7x32xf32>
    %68 = tpu.matmul %66, %67, %cst_25 {dimension_numbers = #tpu.dot_dimension_numbers<[1], [0], [0], [1], [0, 0, 1, 1], [], []>} : vector<7x96xbf16>, vector<96x32xbf16>, vector<7x32xf32> -> vector<7x32xf32>
    %c0_26 = arith.constant 0 : index
    %c0_27 = arith.constant 0 : index
    %69 = vector.load %arg7[%c0_26, %c0_27] : memref<1x32xf32, #tpu.memory_space<vmem>>, vector<1x32xf32>
    %70 = vector.broadcast %69 : vector<1x32xf32> to vector<7x32xf32>
    %71 = arith.addf %68, %70 : vector<7x32xf32>
    %cst_28 = arith.constant 0.000000e+00 : f32
    %72 = vector.broadcast %cst_28 : f32 to vector<7x32xf32>
    %73 = arith.maximumf %71, %72 : vector<7x32xf32>
    %cst_29 = arith.constant 0.000000e+00 : f32
    %74 = vector.broadcast %cst_29 : f32 to vector<3x32xf32>
    %75 = tpu.concatenate %74, %73, %74 in 0 : vector<3x32xf32>, vector<7x32xf32>, vector<3x32xf32> -> vector<13x32xf32>
    %76 = vector.extract_strided_slice %75 {offsets = [0, 0], sizes = [7, 32], strides = [1, 1]} : vector<13x32xf32> to vector<7x32xf32>
    %77 = vector.extract_strided_slice %75 {offsets = [3, 0], sizes = [7, 32], strides = [1, 1]} : vector<13x32xf32> to vector<7x32xf32>
    %78 = vector.extract_strided_slice %75 {offsets = [6, 0], sizes = [7, 32], strides = [1, 1]} : vector<13x32xf32> to vector<7x32xf32>
    %79 = tpu.concatenate %76, %77, %78 in 1 : vector<7x32xf32>, vector<7x32xf32>, vector<7x32xf32> -> vector<7x96xf32>
    %80 = arith.truncf %79 : vector<7x96xf32> to vector<7x96xbf16>
    %c0_30 = arith.constant 0 : index
    %c0_31 = arith.constant 0 : index
    %81 = vector.load %arg8[%c0_30, %c0_31] : memref<96x32xbf16, #tpu.memory_space<vmem>>, vector<96x32xbf16>
    %cst_32 = arith.constant dense<0.000000e+00> : vector<7x32xf32>
    %82 = tpu.matmul %80, %81, %cst_32 {dimension_numbers = #tpu.dot_dimension_numbers<[1], [0], [0], [1], [0, 0, 1, 1], [], []>} : vector<7x96xbf16>, vector<96x32xbf16>, vector<7x32xf32> -> vector<7x32xf32>
    %c0_33 = arith.constant 0 : index
    %c0_34 = arith.constant 0 : index
    %83 = vector.load %arg9[%c0_33, %c0_34] : memref<1x32xf32, #tpu.memory_space<vmem>>, vector<1x32xf32>
    %84 = vector.broadcast %83 : vector<1x32xf32> to vector<7x32xf32>
    %85 = arith.addf %82, %84 : vector<7x32xf32>
    %cst_35 = arith.constant 0.000000e+00 : f32
    %86 = vector.broadcast %cst_35 : f32 to vector<7x32xf32>
    %87 = arith.maximumf %85, %86 : vector<7x32xf32>
    %88 = arith.truncf %87 : vector<7x32xf32> to vector<7x32xbf16>
    %c0_36 = arith.constant 0 : index
    %c0_37 = arith.constant 0 : index
    %89 = vector.load %arg10[%c0_36, %c0_37] : memref<32x16xbf16, #tpu.memory_space<vmem>>, vector<32x16xbf16>
    %cst_38 = arith.constant dense<0.000000e+00> : vector<7x16xf32>
    %90 = tpu.matmul %88, %89, %cst_38 {dimension_numbers = #tpu.dot_dimension_numbers<[1], [0], [0], [1], [0, 0, 1, 1], [], []>} : vector<7x32xbf16>, vector<32x16xbf16>, vector<7x16xf32> -> vector<7x16xf32>
    %c0_39 = arith.constant 0 : index
    %c0_40 = arith.constant 0 : index
    %91 = vector.load %arg11[%c0_39, %c0_40] : memref<1x16xf32, #tpu.memory_space<vmem>>, vector<1x16xf32>
    %92 = vector.broadcast %91 : vector<1x16xf32> to vector<7x16xf32>
    %93 = arith.addf %90, %92 : vector<7x16xf32>
    %94 = math.tanh %93 : vector<7x16xf32>
    %95 = arith.truncf %94 : vector<7x16xf32> to vector<7x16xbf16>
    %c0_41 = arith.constant 0 : index
    %c0_42 = arith.constant 0 : index
    %96 = vector.load %arg12[%c0_41, %c0_42] : memref<16x32xbf16, #tpu.memory_space<vmem>>, vector<16x32xbf16>
    %cst_43 = arith.constant dense<0.000000e+00> : vector<7x32xf32>
    %97 = tpu.matmul %95, %96, %cst_43 {dimension_numbers = #tpu.dot_dimension_numbers<[1], [0], [0], [1], [0, 0, 1, 1], [], []>} : vector<7x16xbf16>, vector<16x32xbf16>, vector<7x32xf32> -> vector<7x32xf32>
    %c0_44 = arith.constant 0 : index
    %c0_45 = arith.constant 0 : index
    %98 = vector.load %arg13[%c0_44, %c0_45] : memref<1x32xf32, #tpu.memory_space<vmem>>, vector<1x32xf32>
    %99 = vector.broadcast %98 : vector<1x32xf32> to vector<7x32xf32>
    %100 = arith.addf %97, %99 : vector<7x32xf32>
    %cst_46 = arith.constant dense<0xFF800000> : vector<32xf32>
    %101 = vector.multi_reduction <maximumf>, %100, %cst_46 [0] : vector<7x32xf32> to vector<32xf32>
    %102 = vector.shape_cast %101 : vector<32xf32> to vector<1x32xf32>
    %103 = vector.broadcast %102 : vector<1x32xf32> to vector<7x32xf32>
    %104 = arith.subf %100, %103 : vector<7x32xf32>
    %105 = math.exp %104 : vector<7x32xf32>
    %cst_47 = arith.constant dense<0.000000e+00> : vector<32xf32>
    %106 = vector.multi_reduction <add>, %105, %cst_47 [0] : vector<7x32xf32> to vector<32xf32>
    %107 = vector.shape_cast %106 : vector<32xf32> to vector<1x32xf32>
    %108 = tpu.reciprocal %107 {approx = true} : vector<1x32xf32> -> vector<1x32xf32>
    %109 = vector.broadcast %108 : vector<1x32xf32> to vector<7x32xf32>
    %110 = arith.mulf %105, %109 : vector<7x32xf32>
    %111 = arith.mulf %110, %87 : vector<7x32xf32>
    %cst_48 = arith.constant dense<0.000000e+00> : vector<32xf32>
    %112 = vector.multi_reduction <add>, %111, %cst_48 [0] : vector<7x32xf32> to vector<32xf32>
    %113 = vector.shape_cast %112 : vector<32xf32> to vector<1x32xf32>
    %114 = arith.mulf %110, %87 : vector<7x32xf32>
    %115 = arith.mulf %114, %87 : vector<7x32xf32>
    %cst_49 = arith.constant dense<0.000000e+00> : vector<32xf32>
    %116 = vector.multi_reduction <add>, %115, %cst_49 [0] : vector<7x32xf32> to vector<32xf32>
    %117 = vector.shape_cast %116 : vector<32xf32> to vector<1x32xf32>
    %118 = arith.mulf %113, %113 : vector<1x32xf32>
    %119 = arith.subf %117, %118 : vector<1x32xf32>
    %cst_50 = arith.constant 9.99999993E-9 : f32
    %120 = vector.broadcast %cst_50 : f32 to vector<1x32xf32>
    %121 = arith.maximumf %119, %120 : vector<1x32xf32>
    %122 = math.sqrt %121 : vector<1x32xf32>
    %123 = tpu.concatenate %113, %122 in 1 : vector<1x32xf32>, vector<1x32xf32> -> vector<1x64xf32>
    %124 = arith.truncf %123 : vector<1x64xf32> to vector<1x64xbf16>
    %c0_51 = arith.constant 0 : index
    %c0_52 = arith.constant 0 : index
    %125 = vector.load %arg14[%c0_51, %c0_52] : memref<64x48xbf16, #tpu.memory_space<vmem>>, vector<64x48xbf16>
    %cst_53 = arith.constant dense<0.000000e+00> : vector<1x48xf32>
    %126 = tpu.matmul %124, %125, %cst_53 {dimension_numbers = #tpu.dot_dimension_numbers<[1], [0], [0], [1], [0, 0, 1, 1], [], []>} : vector<1x64xbf16>, vector<64x48xbf16>, vector<1x48xf32> -> vector<1x48xf32>
    %c0_54 = arith.constant 0 : index
    %c0_55 = arith.constant 0 : index
    %127 = vector.load %arg15[%c0_54, %c0_55] : memref<1x48xf32, #tpu.memory_space<vmem>>, vector<1x48xf32>
    %128 = arith.addf %126, %127 : vector<1x48xf32>
    %129 = arith.truncf %128 : vector<1x48xf32> to vector<1x48xbf16>
    %c0_56 = arith.constant 0 : index
    %c0_57 = arith.constant 0 : index
    %130 = vector.load %arg16[%c0_56, %c0_57] : memref<48x10xbf16, #tpu.memory_space<vmem>>, vector<48x10xbf16>
    %cst_58 = arith.constant dense<0.000000e+00> : vector<1x10xf32>
    %131 = tpu.matmul %129, %130, %cst_58 {dimension_numbers = #tpu.dot_dimension_numbers<[1], [0], [0], [1], [0, 0, 1, 1], [], []>} : vector<1x48xbf16>, vector<48x10xbf16>, vector<1x10xf32> -> vector<1x10xf32>
    %c0_59 = arith.constant 0 : index
    %c0_60 = arith.constant 0 : index
    %132 = vector.load %arg17[%c0_59, %c0_60] : memref<1x10xf32, #tpu.memory_space<vmem>>, vector<1x10xf32>
    %133 = arith.addf %131, %132 : vector<1x10xf32>
    %cst_61 = arith.constant 0.000000e+00 : f32
    %134 = vector.broadcast %cst_61 : f32 to vector<1x70xf32>
    %135 = tpu.concatenate %133, %128, %134 in 1 : vector<1x10xf32>, vector<1x48xf32>, vector<1x70xf32> -> vector<1x128xf32>
    %136 = vector.extract_strided_slice %23 {offsets = [7, 0], sizes = [7, 32], strides = [1, 1]} : vector<14x32xf32> to vector<7x32xf32>
    %cst_62 = arith.constant dense<0.000000e+00> : vector<32xf32>
    %137 = vector.multi_reduction <add>, %136, %cst_62 [0] : vector<7x32xf32> to vector<32xf32>
    %138 = vector.shape_cast %137 : vector<32xf32> to vector<1x32xf32>
    %cst_63 = arith.constant 7.000000e+00 : f32
    %139 = vector.broadcast %cst_63 : f32 to vector<1x32xf32>
    %140 = arith.divf %138, %139 : vector<1x32xf32>
    %141 = vector.broadcast %140 : vector<1x32xf32> to vector<7x32xf32>
    %142 = arith.subf %136, %141 : vector<7x32xf32>
    %143 = arith.mulf %142, %142 : vector<7x32xf32>
    %cst_64 = arith.constant dense<0.000000e+00> : vector<32xf32>
    %144 = vector.multi_reduction <add>, %143, %cst_64 [0] : vector<7x32xf32> to vector<32xf32>
    %145 = vector.shape_cast %144 : vector<32xf32> to vector<1x32xf32>
    %cst_65 = arith.constant 6.000000e+00 : f32
    %146 = vector.broadcast %cst_65 : f32 to vector<1x32xf32>
    %147 = arith.divf %145, %146 : vector<1x32xf32>
    %148 = math.sqrt %147 : vector<1x32xf32>
    %cst_66 = arith.constant 9.99999974E-6 : f32
    %149 = vector.broadcast %cst_66 : f32 to vector<1x32xf32>
    %150 = arith.addf %148, %149 : vector<1x32xf32>
    %151 = tpu.reciprocal %150 {approx = true} : vector<1x32xf32> -> vector<1x32xf32>
    %152 = vector.broadcast %140 : vector<1x32xf32> to vector<7x32xf32>
    %153 = arith.subf %136, %152 : vector<7x32xf32>
    %154 = vector.broadcast %151 : vector<1x32xf32> to vector<7x32xf32>
    %155 = arith.mulf %153, %154 : vector<7x32xf32>
    %cst_67 = arith.constant 0.000000e+00 : f32
    %156 = vector.broadcast %cst_67 : f32 to vector<2x32xf32>
    %157 = tpu.concatenate %156, %155, %156 in 0 : vector<2x32xf32>, vector<7x32xf32>, vector<2x32xf32> -> vector<11x32xf32>
    %158 = vector.extract_strided_slice %157 {offsets = [0, 0], sizes = [7, 32], strides = [1, 1]} : vector<11x32xf32> to vector<7x32xf32>
    %159 = vector.extract_strided_slice %157 {offsets = [1, 0], sizes = [7, 32], strides = [1, 1]} : vector<11x32xf32> to vector<7x32xf32>
    %160 = vector.extract_strided_slice %157 {offsets = [2, 0], sizes = [7, 32], strides = [1, 1]} : vector<11x32xf32> to vector<7x32xf32>
    %161 = vector.extract_strided_slice %157 {offsets = [3, 0], sizes = [7, 32], strides = [1, 1]} : vector<11x32xf32> to vector<7x32xf32>
    %162 = vector.extract_strided_slice %157 {offsets = [4, 0], sizes = [7, 32], strides = [1, 1]} : vector<11x32xf32> to vector<7x32xf32>
    %163 = tpu.concatenate %158, %159, %160, %161, %162 in 1 : vector<7x32xf32>, vector<7x32xf32>, vector<7x32xf32>, vector<7x32xf32>, vector<7x32xf32> -> vector<7x160xf32>
    %164 = arith.truncf %163 : vector<7x160xf32> to vector<7x160xbf16>
    %c0_68 = arith.constant 0 : index
    %c0_69 = arith.constant 0 : index
    %165 = vector.load %arg4[%c0_68, %c0_69] : memref<160x32xbf16, #tpu.memory_space<vmem>>, vector<160x32xbf16>
    %cst_70 = arith.constant dense<0.000000e+00> : vector<7x32xf32>
    %166 = tpu.matmul %164, %165, %cst_70 {dimension_numbers = #tpu.dot_dimension_numbers<[1], [0], [0], [1], [0, 0, 1, 1], [], []>} : vector<7x160xbf16>, vector<160x32xbf16>, vector<7x32xf32> -> vector<7x32xf32>
    %c0_71 = arith.constant 0 : index
    %c0_72 = arith.constant 0 : index
    %167 = vector.load %arg5[%c0_71, %c0_72] : memref<1x32xf32, #tpu.memory_space<vmem>>, vector<1x32xf32>
    %168 = vector.broadcast %167 : vector<1x32xf32> to vector<7x32xf32>
    %169 = arith.addf %166, %168 : vector<7x32xf32>
    %cst_73 = arith.constant 0.000000e+00 : f32
    %170 = vector.broadcast %cst_73 : f32 to vector<7x32xf32>
    %171 = arith.maximumf %169, %170 : vector<7x32xf32>
    %cst_74 = arith.constant 0.000000e+00 : f32
    %172 = vector.broadcast %cst_74 : f32 to vector<2x32xf32>
    %173 = tpu.concatenate %172, %171, %172 in 0 : vector<2x32xf32>, vector<7x32xf32>, vector<2x32xf32> -> vector<11x32xf32>
    %174 = vector.extract_strided_slice %173 {offsets = [0, 0], sizes = [7, 32], strides = [1, 1]} : vector<11x32xf32> to vector<7x32xf32>
    %175 = vector.extract_strided_slice %173 {offsets = [2, 0], sizes = [7, 32], strides = [1, 1]} : vector<11x32xf32> to vector<7x32xf32>
    %176 = vector.extract_strided_slice %173 {offsets = [4, 0], sizes = [7, 32], strides = [1, 1]} : vector<11x32xf32> to vector<7x32xf32>
    %177 = tpu.concatenate %174, %175, %176 in 1 : vector<7x32xf32>, vector<7x32xf32>, vector<7x32xf32> -> vector<7x96xf32>
    %178 = arith.truncf %177 : vector<7x96xf32> to vector<7x96xbf16>
    %c0_75 = arith.constant 0 : index
    %c0_76 = arith.constant 0 : index
    %179 = vector.load %arg6[%c0_75, %c0_76] : memref<96x32xbf16, #tpu.memory_space<vmem>>, vector<96x32xbf16>
    %cst_77 = arith.constant dense<0.000000e+00> : vector<7x32xf32>
    %180 = tpu.matmul %178, %179, %cst_77 {dimension_numbers = #tpu.dot_dimension_numbers<[1], [0], [0], [1], [0, 0, 1, 1], [], []>} : vector<7x96xbf16>, vector<96x32xbf16>, vector<7x32xf32> -> vector<7x32xf32>
    %c0_78 = arith.constant 0 : index
    %c0_79 = arith.constant 0 : index
    %181 = vector.load %arg7[%c0_78, %c0_79] : memref<1x32xf32, #tpu.memory_space<vmem>>, vector<1x32xf32>
    %182 = vector.broadcast %181 : vector<1x32xf32> to vector<7x32xf32>
    %183 = arith.addf %180, %182 : vector<7x32xf32>
    %cst_80 = arith.constant 0.000000e+00 : f32
    %184 = vector.broadcast %cst_80 : f32 to vector<7x32xf32>
    %185 = arith.maximumf %183, %184 : vector<7x32xf32>
    %cst_81 = arith.constant 0.000000e+00 : f32
    %186 = vector.broadcast %cst_81 : f32 to vector<3x32xf32>
    %187 = tpu.concatenate %186, %185, %186 in 0 : vector<3x32xf32>, vector<7x32xf32>, vector<3x32xf32> -> vector<13x32xf32>
    %188 = vector.extract_strided_slice %187 {offsets = [0, 0], sizes = [7, 32], strides = [1, 1]} : vector<13x32xf32> to vector<7x32xf32>
    %189 = vector.extract_strided_slice %187 {offsets = [3, 0], sizes = [7, 32], strides = [1, 1]} : vector<13x32xf32> to vector<7x32xf32>
    %190 = vector.extract_strided_slice %187 {offsets = [6, 0], sizes = [7, 32], strides = [1, 1]} : vector<13x32xf32> to vector<7x32xf32>
    %191 = tpu.concatenate %188, %189, %190 in 1 : vector<7x32xf32>, vector<7x32xf32>, vector<7x32xf32> -> vector<7x96xf32>
    %192 = arith.truncf %191 : vector<7x96xf32> to vector<7x96xbf16>
    %c0_82 = arith.constant 0 : index
    %c0_83 = arith.constant 0 : index
    %193 = vector.load %arg8[%c0_82, %c0_83] : memref<96x32xbf16, #tpu.memory_space<vmem>>, vector<96x32xbf16>
    %cst_84 = arith.constant dense<0.000000e+00> : vector<7x32xf32>
    %194 = tpu.matmul %192, %193, %cst_84 {dimension_numbers = #tpu.dot_dimension_numbers<[1], [0], [0], [1], [0, 0, 1, 1], [], []>} : vector<7x96xbf16>, vector<96x32xbf16>, vector<7x32xf32> -> vector<7x32xf32>
    %c0_85 = arith.constant 0 : index
    %c0_86 = arith.constant 0 : index
    %195 = vector.load %arg9[%c0_85, %c0_86] : memref<1x32xf32, #tpu.memory_space<vmem>>, vector<1x32xf32>
    %196 = vector.broadcast %195 : vector<1x32xf32> to vector<7x32xf32>
    %197 = arith.addf %194, %196 : vector<7x32xf32>
    %cst_87 = arith.constant 0.000000e+00 : f32
    %198 = vector.broadcast %cst_87 : f32 to vector<7x32xf32>
    %199 = arith.maximumf %197, %198 : vector<7x32xf32>
    %200 = arith.truncf %199 : vector<7x32xf32> to vector<7x32xbf16>
    %c0_88 = arith.constant 0 : index
    %c0_89 = arith.constant 0 : index
    %201 = vector.load %arg10[%c0_88, %c0_89] : memref<32x16xbf16, #tpu.memory_space<vmem>>, vector<32x16xbf16>
    %cst_90 = arith.constant dense<0.000000e+00> : vector<7x16xf32>
    %202 = tpu.matmul %200, %201, %cst_90 {dimension_numbers = #tpu.dot_dimension_numbers<[1], [0], [0], [1], [0, 0, 1, 1], [], []>} : vector<7x32xbf16>, vector<32x16xbf16>, vector<7x16xf32> -> vector<7x16xf32>
    %c0_91 = arith.constant 0 : index
    %c0_92 = arith.constant 0 : index
    %203 = vector.load %arg11[%c0_91, %c0_92] : memref<1x16xf32, #tpu.memory_space<vmem>>, vector<1x16xf32>
    %204 = vector.broadcast %203 : vector<1x16xf32> to vector<7x16xf32>
    %205 = arith.addf %202, %204 : vector<7x16xf32>
    %206 = math.tanh %205 : vector<7x16xf32>
    %207 = arith.truncf %206 : vector<7x16xf32> to vector<7x16xbf16>
    %c0_93 = arith.constant 0 : index
    %c0_94 = arith.constant 0 : index
    %208 = vector.load %arg12[%c0_93, %c0_94] : memref<16x32xbf16, #tpu.memory_space<vmem>>, vector<16x32xbf16>
    %cst_95 = arith.constant dense<0.000000e+00> : vector<7x32xf32>
    %209 = tpu.matmul %207, %208, %cst_95 {dimension_numbers = #tpu.dot_dimension_numbers<[1], [0], [0], [1], [0, 0, 1, 1], [], []>} : vector<7x16xbf16>, vector<16x32xbf16>, vector<7x32xf32> -> vector<7x32xf32>
    %c0_96 = arith.constant 0 : index
    %c0_97 = arith.constant 0 : index
    %210 = vector.load %arg13[%c0_96, %c0_97] : memref<1x32xf32, #tpu.memory_space<vmem>>, vector<1x32xf32>
    %211 = vector.broadcast %210 : vector<1x32xf32> to vector<7x32xf32>
    %212 = arith.addf %209, %211 : vector<7x32xf32>
    %cst_98 = arith.constant dense<0xFF800000> : vector<32xf32>
    %213 = vector.multi_reduction <maximumf>, %212, %cst_98 [0] : vector<7x32xf32> to vector<32xf32>
    %214 = vector.shape_cast %213 : vector<32xf32> to vector<1x32xf32>
    %215 = vector.broadcast %214 : vector<1x32xf32> to vector<7x32xf32>
    %216 = arith.subf %212, %215 : vector<7x32xf32>
    %217 = math.exp %216 : vector<7x32xf32>
    %cst_99 = arith.constant dense<0.000000e+00> : vector<32xf32>
    %218 = vector.multi_reduction <add>, %217, %cst_99 [0] : vector<7x32xf32> to vector<32xf32>
    %219 = vector.shape_cast %218 : vector<32xf32> to vector<1x32xf32>
    %220 = tpu.reciprocal %219 {approx = true} : vector<1x32xf32> -> vector<1x32xf32>
    %221 = vector.broadcast %220 : vector<1x32xf32> to vector<7x32xf32>
    %222 = arith.mulf %217, %221 : vector<7x32xf32>
    %223 = arith.mulf %222, %199 : vector<7x32xf32>
    %cst_100 = arith.constant dense<0.000000e+00> : vector<32xf32>
    %224 = vector.multi_reduction <add>, %223, %cst_100 [0] : vector<7x32xf32> to vector<32xf32>
    %225 = vector.shape_cast %224 : vector<32xf32> to vector<1x32xf32>
    %226 = arith.mulf %222, %199 : vector<7x32xf32>
    %227 = arith.mulf %226, %199 : vector<7x32xf32>
    %cst_101 = arith.constant dense<0.000000e+00> : vector<32xf32>
    %228 = vector.multi_reduction <add>, %227, %cst_101 [0] : vector<7x32xf32> to vector<32xf32>
    %229 = vector.shape_cast %228 : vector<32xf32> to vector<1x32xf32>
    %230 = arith.mulf %225, %225 : vector<1x32xf32>
    %231 = arith.subf %229, %230 : vector<1x32xf32>
    %cst_102 = arith.constant 9.99999993E-9 : f32
    %232 = vector.broadcast %cst_102 : f32 to vector<1x32xf32>
    %233 = arith.maximumf %231, %232 : vector<1x32xf32>
    %234 = math.sqrt %233 : vector<1x32xf32>
    %235 = tpu.concatenate %225, %234 in 1 : vector<1x32xf32>, vector<1x32xf32> -> vector<1x64xf32>
    %236 = arith.truncf %235 : vector<1x64xf32> to vector<1x64xbf16>
    %c0_103 = arith.constant 0 : index
    %c0_104 = arith.constant 0 : index
    %237 = vector.load %arg14[%c0_103, %c0_104] : memref<64x48xbf16, #tpu.memory_space<vmem>>, vector<64x48xbf16>
    %cst_105 = arith.constant dense<0.000000e+00> : vector<1x48xf32>
    %238 = tpu.matmul %236, %237, %cst_105 {dimension_numbers = #tpu.dot_dimension_numbers<[1], [0], [0], [1], [0, 0, 1, 1], [], []>} : vector<1x64xbf16>, vector<64x48xbf16>, vector<1x48xf32> -> vector<1x48xf32>
    %c0_106 = arith.constant 0 : index
    %c0_107 = arith.constant 0 : index
    %239 = vector.load %arg15[%c0_106, %c0_107] : memref<1x48xf32, #tpu.memory_space<vmem>>, vector<1x48xf32>
    %240 = arith.addf %238, %239 : vector<1x48xf32>
    %241 = arith.truncf %240 : vector<1x48xf32> to vector<1x48xbf16>
    %c0_108 = arith.constant 0 : index
    %c0_109 = arith.constant 0 : index
    %242 = vector.load %arg16[%c0_108, %c0_109] : memref<48x10xbf16, #tpu.memory_space<vmem>>, vector<48x10xbf16>
    %cst_110 = arith.constant dense<0.000000e+00> : vector<1x10xf32>
    %243 = tpu.matmul %241, %242, %cst_110 {dimension_numbers = #tpu.dot_dimension_numbers<[1], [0], [0], [1], [0, 0, 1, 1], [], []>} : vector<1x48xbf16>, vector<48x10xbf16>, vector<1x10xf32> -> vector<1x10xf32>
    %c0_111 = arith.constant 0 : index
    %c0_112 = arith.constant 0 : index
    %244 = vector.load %arg17[%c0_111, %c0_112] : memref<1x10xf32, #tpu.memory_space<vmem>>, vector<1x10xf32>
    %245 = arith.addf %243, %244 : vector<1x10xf32>
    %cst_113 = arith.constant 0.000000e+00 : f32
    %246 = vector.broadcast %cst_113 : f32 to vector<1x70xf32>
    %247 = tpu.concatenate %245, %240, %246 in 1 : vector<1x10xf32>, vector<1x48xf32>, vector<1x70xf32> -> vector<1x128xf32>
    %248 = tpu.concatenate %135, %247 in 0 : vector<1x128xf32>, vector<1x128xf32> -> vector<2x128xf32>
    %c0_114 = arith.constant 0 : index
    %c0_115 = arith.constant 0 : index
    %249 = vector.load %arg18[%c0_114, %c0_115] : memref<2x128xf32, #tpu.memory_space<vmem>>, vector<2x128xf32>
    tpu.vector_store %arg18[%c0_114, %c0_115], %248 {strides = array<i32>} : memref<2x128xf32, #tpu.memory_space<vmem>>, vector<2x128xf32>,
    return
  }
  func.func @transform_0(%arg0: i32) -> (i32, i32, i32) {
    %c0_i32 = arith.constant 0 : i32
    %c0_i32_0 = arith.constant 0 : i32
    %c0_i32_1 = arith.constant 0 : i32
    %c0_i32_2 = arith.constant 0 : i32
    return %c0_i32, %c0_i32_0, %c0_i32_1 : i32, i32, i32
  }
  func.func @transform_1(%arg0: i32) -> (i32, i32) {
    %c0_i32 = arith.constant 0 : i32
    %c0_i32_0 = arith.constant 0 : i32
    %c0_i32_1 = arith.constant 0 : i32
    return %c0_i32, %c0_i32_0 : i32, i32
  }
  func.func @transform_2(%arg0: i32) -> (i32, i32) {
    %c0_i32 = arith.constant 0 : i32
    %c0_i32_0 = arith.constant 0 : i32
    %c0_i32_1 = arith.constant 0 : i32
    return %c0_i32, %c0_i32_0 : i32, i32
  }
  func.func @transform_3(%arg0: i32) -> (i32, i32) {
    %c0_i32 = arith.constant 0 : i32
    %c0_i32_0 = arith.constant 0 : i32
    %c0_i32_1 = arith.constant 0 : i32
    return %c0_i32, %c0_i32_0 : i32, i32
  }
  func.func @transform_4(%arg0: i32) -> (i32, i32) {
    %c0_i32 = arith.constant 0 : i32
    %c0_i32_0 = arith.constant 0 : i32
    %c0_i32_1 = arith.constant 0 : i32
    return %c0_i32, %c0_i32_0 : i32, i32
  }
  func.func @transform_5(%arg0: i32) -> (i32, i32) {
    %c0_i32 = arith.constant 0 : i32
    %c0_i32_0 = arith.constant 0 : i32
    %c0_i32_1 = arith.constant 0 : i32
    return %c0_i32, %c0_i32_0 : i32, i32
  }
  func.func @transform_6(%arg0: i32) -> (i32, i32) {
    %c0_i32 = arith.constant 0 : i32
    %c0_i32_0 = arith.constant 0 : i32
    %c0_i32_1 = arith.constant 0 : i32
    return %c0_i32, %c0_i32_0 : i32, i32
  }
  func.func @transform_7(%arg0: i32) -> (i32, i32) {
    %c0_i32 = arith.constant 0 : i32
    %c0_i32_0 = arith.constant 0 : i32
    %c0_i32_1 = arith.constant 0 : i32
    return %c0_i32, %c0_i32_0 : i32, i32
  }
  func.func @transform_8(%arg0: i32) -> (i32, i32) {
    %c0_i32 = arith.constant 0 : i32
    %c0_i32_0 = arith.constant 0 : i32
    %c0_i32_1 = arith.constant 0 : i32
    return %c0_i32, %c0_i32_0 : i32, i32
  }
  func.func @transform_9(%arg0: i32) -> (i32, i32) {
    %c0_i32 = arith.constant 0 : i32
    %c0_i32_0 = arith.constant 0 : i32
    %c0_i32_1 = arith.constant 0 : i32
    return %c0_i32, %c0_i32_0 : i32, i32
  }
  func.func @transform_10(%arg0: i32) -> (i32, i32) {
    %c0_i32 = arith.constant 0 : i32
    %c0_i32_0 = arith.constant 0 : i32
    %c0_i32_1 = arith.constant 0 : i32
    return %c0_i32, %c0_i32_0 : i32, i32
  }
  func.func @transform_11(%arg0: i32) -> (i32, i32) {
    %c0_i32 = arith.constant 0 : i32
    %c0_i32_0 = arith.constant 0 : i32
    %c0_i32_1 = arith.constant 0 : i32
    return %c0_i32, %c0_i32_0 : i32, i32
  }
  func.func @transform_12(%arg0: i32) -> (i32, i32) {
    %c0_i32 = arith.constant 0 : i32
    %c0_i32_0 = arith.constant 0 : i32
    %c0_i32_1 = arith.constant 0 : i32
    return %c0_i32, %c0_i32_0 : i32, i32
  }
  func.func @transform_13(%arg0: i32) -> (i32, i32) {
    %c0_i32 = arith.constant 0 : i32
    %c0_i32_0 = arith.constant 0 : i32
    %c0_i32_1 = arith.constant 0 : i32
    return %c0_i32, %c0_i32_0 : i32, i32
  }
  func.func @transform_14(%arg0: i32) -> (i32, i32) {
    %c0_i32 = arith.constant 0 : i32
    %c0_i32_0 = arith.constant 0 : i32
    %c0_i32_1 = arith.constant 0 : i32
    return %c0_i32, %c0_i32_0 : i32, i32
  }
  func.func @transform_15(%arg0: i32) -> (i32, i32) {
    %c0_i32 = arith.constant 0 : i32
    %c0_i32_0 = arith.constant 0 : i32
    %c0_i32_1 = arith.constant 0 : i32
    return %c0_i32, %c0_i32_0 : i32, i32
  }
  func.func @transform_16(%arg0: i32) -> (i32, i32) {
    %c0_i32 = arith.constant 0 : i32
    %c0_i32_0 = arith.constant 0 : i32
    %c0_i32_1 = arith.constant 0 : i32
    return %c0_i32, %c0_i32_0 : i32, i32
  }
  func.func @transform_17(%arg0: i32) -> (i32, i32) {
    %c0_i32 = arith.constant 0 : i32
    %c0_i32_0 = arith.constant 0 : i32
    %c0_i32_1 = arith.constant 0 : i32
    return %c0_i32, %c0_i32_0 : i32, i32
  }
}

</mosaic_0001>

<bundles_post_ra>
// kernel: ecapa_forward.1
= control target key start
LH: loop header
LB: loop body
LE: loop exit
PB: predicated region body
PF: predicated region fallthrough
CT: control target
= control target key end

     0   :  { %v2170_v1 = vmov 0.0   ;;  %vm100_vm0 = vsmask.f32 3328  ;;  %vm99_vm1 = vcmask 1043456   ;;  %vm2171_vm3 = vmmov 0   ;;  %s2174_s28 = smov 96   ;;  %s2918_s1 = inlined_call_operand.vmem [shape: bf16[256,256], index: 1, kind: input, shape index: {}]   ;;  %s2919_s0 = inlined_call_operand.vmem [shape: bf16[2,8,128], index: 0, kind: input, shape index: {}]   ;;  %s2920_s2 = inlined_call_operand.vmem [shape: bf16[128,32], index: 2, kind: input, shape index: {}]   ;;  %s2921_s3 = inlined_call_operand.vmem [shape: bf16[160,32], index: 3, kind: input, shape index: {}]   ;;  %s2922_s5 = inlined_call_operand.vmem [shape: bf16[96,32], index: 5, kind: input, shape index: {}]   ;;  %s2923_s4 = inlined_call_operand.vmem [shape: f32[1,32], index: 4, kind: input, shape index: {}]   ;;  %s2924_s7 = inlined_call_operand.vmem [shape: bf16[96,32], index: 7, kind: input, shape index: {}]   ;;  %s2925_s6 = inlined_call_operand.vmem [shape: f32[1,32], index: 6, kind: input, shape index: {}]   ;;  %s2926_s9 = inlined_call_operand.vmem [shape: bf16[32,16], index: 9, kind: input, shape index: {}]   ;;  %s2927_s8 = inlined_call_operand.vmem [shape: f32[1,32], index: 8, kind: input, shape index: {}]   ;;  %s2928_s11 = inlined_call_operand.vmem [shape: bf16[16,32], index: 11, kind: input, shape index: {}]   ;;  %s2929_s10 = inlined_call_operand.vmem [shape: f32[1,16], index: 10, kind: input, shape index: {}]   ;;  %s2930_s13 = inlined_call_operand.vmem [shape: bf16[64,48], index: 13, kind: input, shape index: {}]   ;;  %s2931_s12 = inlined_call_operand.vmem [shape: f32[1,32], index: 12, kind: input, shape index: {}]   ;;  %s2932_s15 = inlined_call_operand.vmem [shape: bf16[48,10], index: 15, kind: input, shape index: {}]   ;;  %s2933_s14 = inlined_call_operand.vmem [shape: f32[1,48], index: 14, kind: input, shape index: {}]   ;;  %s2934_s16 = inlined_call_operand.vmem [shape: f32[1,10], index: 16, kind: input, shape index: {}]   ;;  %s2935_s17 = inlined_call_operand.vmem [shape: f32[2,128], index: 17, kind: output, shape index: {}]  }
   0x1   :  { %2938 = sst [smem:[#allocation2_spill]] %s2918_s1  ;;  %1889 = vmatprep.subr.bf16.mxu1 %v2170_v1  ;;  %v2102_v19 = vld [vmem:[%s2920_s2] sm:$0xff]   ;;  %v2103_v25 = vld [vmem:[%s2920_s2 + $0x8] sm:$0xff]   ;;  %v2104_v31 = vld [vmem:[%s2920_s2 + $0x10] sm:$0xff]   ;;  %1905 = vmatprep.mubr.msk.bf16.mxu1 %vm2171_vm3, %v2170_v1  ;;  %vm455_vm4 = vcmask 260096   ;;  %vm491_vm5 = vcmask 1040384  }
   0x2   :  { %2939 = sst [smem:[#allocation3_spill]] %s2919_s0  ;;  %s2940_s26 = sld [smem:[#allocation2_spill]]  ;;  %1890 = vmatpush3.bf16.msra.mxu1 %v2102_v19  ;;  %vm2352_vm2 = vmand %vm99_vm1, %vm100_vm0  ;;  %v2105_v40 = vld [vmem:[%s2920_s2 + $0x18] sm:$0xff]   ;;  %v2106_v45 = vld [vmem:[%s2920_s2 + $0x20] sm:$0xff]   ;;  %vm489_vm10 = vcmask 1041408   ;;  %vm506_vm11 = vcmask 1044480  }
   0x3   :  { %s2941_s24 = sld [smem:[#allocation3_spill]]  ;;  %1891 = vmatprep.subr.bf16.mxu1 %v2170_v1  ;;  %v2107_v48 = vld [vmem:[%s2920_s2 + $0x28] sm:$0xff]   ;;  %v2458_v19 = vld [vmem:[%s2921_s3 + $0x20] sm:$0xff]   ;;  %vm499_vm12 = vcmask 1045504   ;;  %vm518_vm13 = vcmask 261120   ;;  %vm781_vm14 = vcmask 1042432  }
   0x4   :  { %s2175_s29 = smov 64   ;;  %vm520_vm15 = vcmask 523264   ;;  %vm522_vm0 = vcmask 785408  }
   0x6   :  { %1892 = vmatpush3.bf16.msra.mxu1 %v2103_v25 }
   0x7   :  { %1893 = vmatprep.subr.bf16.mxu1 %v2170_v1 }
   0x8   :  { %v2052_v0 = vld [vmem:[%s2940_s26 + $0x4] ss:$8 sps:$4 sm:$0xff]   ;;  %v2054_v2 = vld [vmem:[%s2940_s26] ss:$8 sps:$4 sm:$0xff]   ;;  %v2055_v3 = vld [vmem:[%s2940_s26 + $0x14] ss:$8 sps:$4 sm:$0xff]  }
   0x9   :  { %296 = vmatprep.subr.bf16.mxu0 %v2052_v0  ;;  %v2057_v4 = vld [vmem:[%s2940_s26 + $0x10] ss:$8 sps:$4 sm:$0xff]   ;;  %v2058_v5 = vld [vmem:[%s2940_s26 + $0x24] ss:$8 sps:$4 sm:$0xff]   ;;  %v2060_v6 = vld [vmem:[%s2940_s26 + $0x20] ss:$8 sps:$4 sm:$0xff]  }
   0xa   :  { %297 = vmatpush1.bf16.msra.mxu0 %v2054_v2  ;;  %v2061_v7 = vld [vmem:[%s2940_s26 + $0x34] ss:$8 sps:$4 sm:$0xff]   ;;  %v2063_v8 = vld [vmem:[%s2940_s26 + $0x30] ss:$8 sps:$4 sm:$0xff]   ;;  %v2064_v9 = vld [vmem:[%s2940_s26 + $0x44] ss:$8 sps:$4 sm:$0xff]   ;;  %1894 = vmatpush3.bf16.msra.mxu1 %v2104_v31 }
   0xb   :  { %298 = vmatprep.subr.bf16.mxu0 %v2055_v3  ;;  %v2066_v10 = vld [vmem:[%s2940_s26 + $0x40] ss:$8 sps:$4 sm:$0xff]   ;;  %v2067_v11 = vld [vmem:[%s2940_s26 + $0x54] ss:$8 sps:$4 sm:$0xff]   ;;  %v2069_v12 = vld [vmem:[%s2940_s26 + $0x50] ss:$8 sps:$4 sm:$0xff]   ;;  %1895 = vmatprep.subr.bf16.mxu1 %v2170_v1 }
   0xc   :  { %v2070_v13 = vld [vmem:[%s2940_s26 + $0x64] ss:$8 sps:$4 sm:$0xff]   ;;  %v2310_v14 = vld [vmem:[%s2941_s24] sm:$0xf]  ;;  %v2073_v20 = vld [vmem:[%s2940_s26 + $0x74] ss:$8 sps:$4 sm:$0xff]  }
   0xd   :  { %v2315_v15 = vld [vmem:[%s2941_s24 + $0x4] sm:$0xf]  ;;  %v2072_v16 = vld [vmem:[%s2940_s26 + $0x60] ss:$8 sps:$4 sm:$0xff]   ;;  %v1730_v17 = vcombine.low %v2310_v14, %v2310_v14  ;;  %v2075_v24 = vld [vmem:[%s2940_s26 + $0x70] ss:$8 sps:$4 sm:$0xff]  }
   0xe   :  { %299 = vmatpush1.bf16.msra.mxu0 %v2057_v4  ;;  %v1732_v18 = vcombine.low %v2315_v15, %v2315_v15  ;;  %v2076_v27 = vld [vmem:[%s2940_s26 + $0x84] ss:$8 sps:$4 sm:$0xff]   ;;  %v2078_v34 = vld [vmem:[%s2940_s26 + $0x80] ss:$8 sps:$4 sm:$0xff]   ;;  %v2079_v35 = vld [vmem:[%s2940_s26 + $0x94] ss:$8 sps:$4 sm:$0xff]   ;;  %1896 = vmatpush3.bf16.msra.mxu1 %v2105_v40 }
   0xf   :  { %300 = vmatprep.subr.bf16.mxu0 %v2058_v5  ;;  %v64_v21 = vshll.u32 %v1730_v17, 16  ;;  %v62_v28 = vshrl.u32 %v1730_v17, 16  ;;  %v2081_v42 = vld [vmem:[%s2940_s26 + $0x90] ss:$8 sps:$4 sm:$0xff]   ;;  %v2082_v43 = vld [vmem:[%s2940_s26 + $0xa4] ss:$8 sps:$4 sm:$0xff]   ;;  %1897 = vmatprep.subr.bf16.mxu1 %v2170_v1 }
  0x10   :  { %v75_v22 = vshrl.u32 %v1732_v18, 16  ;;  %v77_v23 = vshll.u32 %v1732_v18, 16  ;;  %v2084_v46 = vld [vmem:[%s2940_s26 + $0xa0] ss:$8 sps:$4 sm:$0xff]   ;;  %v2085_v47 = vld [vmem:[%s2940_s26 + $0xb4] ss:$8 sps:$4 sm:$0xff]  }
  0x11   :  { %v66_v29 = vrot.slane %v64_v21, 1  ;;  %v2087_v49 = vld [vmem:[%s2940_s26 + $0xb0] ss:$8 sps:$4 sm:$0xff]   ;;  %v2088_v50 = vld [vmem:[%s2940_s26 + $0xc4] ss:$8 sps:$4 sm:$0xff]   ;;  %v82_v54 = vshrl.u32 %v2315_v15, 16 }
  0x12   :  { %301 = vmatpush1.bf16.msra.mxu0 %v2060_v6  ;;  %v79_v26 = vrot.slane %v77_v23, 1  ;;  %1898 = vmatpush3.bf16.msra.mxu1 %v2106_v45  ;;  %v2090_v51 = vld [vmem:[%s2940_s26 + $0xc0] ss:$8 sps:$4 sm:$0xff]   ;;  %v2091_v52 = vld [vmem:[%s2940_s26 + $0xd4] ss:$8 sps:$4 sm:$0xff]   ;;  %v85_v55 = vshll.u32 %v2315_v15, 16 }
  0x13   :  { %302 = vmatprep.subr.bf16.mxu0 %v2061_v7  ;;  %v67_v36 = vor.u32 %v66_v29, %v62_v28  ;;  %1899 = vmatprep.subr.bf16.mxu1 %v2170_v1  ;;  %v2093_v53 = vld [vmem:[%s2940_s26 + $0xd0] ss:$8 sps:$4 sm:$0xff]   ;;  %v2094_v56 = vld [vmem:[%s2940_s26 + $0xe4] ss:$8 sps:$4 sm:$0xff]   ;;  %v2096_v57 = vld [vmem:[%s2940_s26 + $0xe0] ss:$8 sps:$4 sm:$0xff]  }
  0x14   :  { %v80_v30 = vor.u32 %v79_v26, %v75_v22  ;;  %v84_v58 = vrot.slane %v82_v54, 4  ;;  %v87_v59 = vrot.slane %v85_v55, 5  ;;  %v2097_v60 = vld [vmem:[%s2940_s26 + $0xf4] ss:$8 sps:$4 sm:$0xff]   ;;  %v2099_v61 = vld [vmem:[%s2940_s26 + $0xf0] ss:$8 sps:$4 sm:$0xff]  }
  0x15   :  { %v2108_v0 = vld [vmem:[%s2920_s2 + $0x30] sm:$0xff]   ;;  %v2109_v2 = vld [vmem:[%s2920_s2 + $0x38] sm:$0xff]   ;;  %v2431_v15 = vld [vmem:[%s2921_s3] sm:$0xff]  }
  0x16   :  { %303 = vmatpush1.bf16.msra.mxu0 %v2063_v8  ;;  %v90_v32 = vshrl.u32 %v80_v30, 16  ;;  %v93_v33 = vshll.u32 %v80_v30, 16  ;;  %1900 = vmatpush3.bf16.msra.mxu1 %v2107_v48  ;;  %v88_v62 = vor.u32 %v87_v59, %v84_v58  ;;  %v2444_v17 = vld [vmem:[%s2921_s3 + $0x10] sm:$0xff]   ;;  %v2451_v18 = vld [vmem:[%s2921_s3 + $0x18] sm:$0xff]  }
  0x17   :  { %304 = vmatprep.subr.bf16.mxu0 %v2064_v9  ;;  %1901 = vmatprep.subr.bf16.mxu1 %v2170_v1  ;;  %v2472_v21 = vld [vmem:[%s2921_s3 + $0x30] sm:$0xff]   ;;  %v2479_v22 = vld [vmem:[%s2921_s3 + $0x38] sm:$0xff]  }
  0x18   :  { %v92_v37 = vrot.slane %v90_v32, 4  ;;  %v95_v38 = vrot.slane %v93_v33, 5  ;;  %v102_v63 = vsel %vm2352_vm2, %v2310_v14, %v88_v62  ;;  %v2172_v14 = vmov 0  }
  0x1a   :  { %305 = vmatpush1.bf16.msra.mxu0 %v2066_v10  ;;  %v96_v41 = vor.u32 %v95_v38, %v92_v37  ;;  %1902 = vmatpush3.bf16.msra.mxu1 %v2108_v0 }
  0x1b   :  { %306 = vmatprep.subr.bf16.mxu0 %v2067_v11  ;;  %1903 = vmatprep.subr.bf16.mxu1 %v2170_v1 }
  0x1c   :  { %v103_v44 = vsel %vm2352_vm2, %v67_v36, %v96_v41  ;;  %vm984_vm2 = vcmask 130048  }
  0x1d   :  { %328 = vmatprep.mubr.bf16.mxu0 %v103_v44 }
  0x1e   :  { %307 = vmatpush1.bf16.msra.mxu0 %v2069_v12  ;;  %1904 = vmatpush3.bf16.msra.mxu1 %v2109_v2 }
  0x1f   :  { %308 = vmatprep.subr.bf16.mxu0 %v2070_v13  ;;  %616 = vmatprep.subr.bf16.mxu1 %v2172_v14 }
  0x22   :  { %309 = vmatpush1.bf16.msra.mxu0 %v2072_v16  ;;  %v2437_v16 = vld [vmem:[%s2921_s3 + $0x8] sm:$0xff]  }
  0x23   :  { %310 = vmatprep.subr.bf16.mxu0 %v2073_v20  ;;  %v2465_v20 = vld [vmem:[%s2921_s3 + $0x28] sm:$0xff]  }
  0x26   :  { %311 = vmatpush1.bf16.msra.mxu0 %v2075_v24 }
  0x27   :  { %312 = vmatprep.subr.bf16.mxu0 %v2076_v27 }
  0x2a   :  { %313 = vmatpush1.bf16.msra.mxu0 %v2078_v34 }
  0x2b   :  { %314 = vmatprep.subr.bf16.mxu0 %v2079_v35 }
  0x2e   :  { %315 = vmatpush1.bf16.msra.mxu0 %v2081_v42 }
  0x2f   :  { %316 = vmatprep.subr.bf16.mxu0 %v2082_v43 }
  0x32   :  { %317 = vmatpush1.bf16.msra.mxu0 %v2084_v46 }
  0x33   :  { %318 = vmatprep.subr.bf16.mxu0 %v2085_v47 }
  0x36   :  { %319 = vmatpush1.bf16.msra.mxu0 %v2087_v49 }
  0x37   :  { %320 = vmatprep.subr.bf16.mxu0 %v2088_v50 }
  0x3a   :  { %321 = vmatpush1.bf16.msra.mxu0 %v2090_v51 }
  0x3b   :  { %322 = vmatprep.subr.bf16.mxu0 %v2091_v52 }
  0x3e   :  { %323 = vmatpush1.bf16.msra.mxu0 %v2093_v53 }
  0x3f   :  { %324 = vmatprep.subr.bf16.mxu0 %v2094_v56 }
  0x42   :  { %325 = vmatpush1.bf16.msra.mxu0 %v2096_v57 }
  0x43   :  { %326 = vmatprep.subr.bf16.mxu0 %v2097_v60 }
  0x46   :  { %327 = vmatpush1.bf16.msra.mxu0 %v2099_v61 }
  0x47   :  { %1909 = vmatprep.subr.bf16.mxu0 %v2170_v1 }
  0x49   :  { %329 = vmatmul.mubr.bf16.vlgmr.msra.gmra.mrb[0].mxu0 %v102_v63 }
  0x4a   :  { %1921 = vmatprep.mubr.msk.bf16.mxu0 %vm2171_vm3, %v2170_v1 }
 0x11c   :  { %v330_v3 = vpop.f32.mrb[0].mxu0 }
 0x11d   :  { %v339_v4 = vmul.f32 %v330_v3, %v330_v3  ;;  %v332_v5 = vpop.f32.mrb[1].mxu0 }
 0x11e   :  { %v341_v6 = vmul.f32 %v332_v5, %v332_v5  ;;  %v334_v7 = vpop.f32.mrb[2].mxu0 }
 0x11f   :  { %v340_v8 = vmul.f32 %v334_v7, %v334_v7  ;;  %v336_v9 = vpop.f32.mrb[3].mxu0 }
 0x120   :  { %v343_v10 = vadd.f32 %v341_v6, %v339_v4  ;;  %v342_v11 = vmul.f32 %v336_v9, %v336_v9 }
 0x122   :  { %v344_v12 = vadd.f32 %v342_v11, %v340_v8 }
 0x124   :  { %v345_v13 = vpack.c.bf16 %v344_v12, %v343_v10 }
 0x126   :  { %1906 = vmatmul.mubr.bf16.vlgmr.msra.gmra.mrb[0].mxu1 %v345_v13 }
 0x127   :  { %617 = vmatpush1.bf16.msra.mxu1 %v2431_v15 }
 0x128   :  { %618 = vmatprep.subr.bf16.mxu1 %v2172_v14 }
 0x12b   :  { %619 = vmatpush1.bf16.msra.mxu1 %v2437_v16 }
 0x12c   :  { %620 = vmatprep.subr.bf16.mxu1 %v2172_v14 }
 0x12f   :  { %621 = vmatpush1.bf16.msra.mxu1 %v2444_v17 }
 0x130   :  { %622 = vmatprep.subr.bf16.mxu1 %v2172_v14 }
 0x133   :  { %623 = vmatpush1.bf16.msra.mxu1 %v2451_v18 }
 0x134   :  { %624 = vmatprep.subr.bf16.mxu1 %v2172_v14 }
 0x137   :  { %625 = vmatpush1.bf16.msra.mxu1 %v2458_v19 }
 0x138   :  { %626 = vmatprep.subr.bf16.mxu1 %v2172_v14 }
 0x13b   :  { %627 = vmatpush1.bf16.msra.mxu1 %v2465_v20 }
 0x13c   :  { %628 = vmatprep.subr.bf16.mxu1 %v2172_v14 }
 0x13f   :  { %629 = vmatpush1.bf16.msra.mxu1 %v2472_v21 }
 0x140   :  { %630 = vmatprep.subr.bf16.mxu1 %v2172_v14 }
 0x143   :  { %631 = vmatpush1.bf16.msra.mxu1 %v2479_v22 }
 0x144   :  { %632 = vmatprep.subr.bf16.mxu1 %v2172_v14 }
 0x1f9   :  { %v444_v23 = vpop.f32.mrb[0].mxu1 }
 0x1fa   :  { %v445_v24 = vadd.f32 5.9604645e-08, %v444_v23  ;;  %v1907_v25 = vpop.f32.mrb[1].mxu1 }
 0x1fb   :  { %v447_v26 = vpop.f32.mrb[2].mxu1 }
 0x1fc   :  { %2142 = vlog2.f32 %v445_v24  ;;  %v448_v27 = vadd.f32 5.9604645e-08, %v447_v26  ;;  %v1908_v28 = vpop.f32.mrb[3].mxu1 }
 0x1fe   :  { %2144 = vlog2.f32 %v448_v27 }
 0x206   :  { %v2143_v29 = vpop.eup %2142 }
 0x207   :  { %v452_v30 = vmul.f32 0.6931472, %v2143_v29 }
 0x208   :  { %v2145_v31 = vpop.eup %2144 }
 0x209   :  { %v456_v32 = vsel %vm455_vm4, %v452_v30, 0.0  ;;  %v454_v33 = vmul.f32 0.6931472, %v2145_v31  ;;  %v1235_v35 = vrot.slane %v452_v30, 7 }
 0x20a   :  { %v457_v34 = vrot.slane %v456_v32, 4 }
 0x20b   :  { %v1236_v36 = vrot.slane %v454_v33, 7 }
 0x20c   :  { %v458_v37 = vadd.f32 %v457_v34, %v456_v32  ;;  %v2501_v34 = vld [vmem:[%s2921_s3 + $0x40] sm:$0xff]  }
 0x20d   :  { %v1237_v38 = vsel %vm491_vm5, %v1235_v35, %v1236_v36  ;;  %633 = vmatpush1.bf16.msra.mxu1 %v2501_v34  ;;  %v2508_v36 = vld [vmem:[%s2921_s3 + $0x48] sm:$0xff]   ;;  %s2173_s3 = smov 32  }
 0x20e   :  { %v459_v39 = vrot.slane %v458_v37, 2  ;;  %v1239_v40 = vsel %vm455_vm4, %v1237_v38, 0.0  ;;  %634 = vmatprep.subr.bf16.mxu1 %v2172_v14 }
 0x20f   :  { %v1240_v41 = vrot.slane %v1239_v40, 4 }
 0x210   :  { %v460_v42 = vadd.f32 %v459_v39, %v458_v37 }
 0x211   :  { %v1241_v43 = vadd.f32 %v1240_v41, %v1239_v40  ;;  %635 = vmatpush1.bf16.msra.mxu1 %v2508_v36 }
 0x212   :  { %v461_v44 = vrot.slane %v460_v42, 1  ;;  %1925 = vmatprep.subr.bf16.mxu1 %v2170_v1 }
 0x213   :  { %v1242_v45 = vrot.slane %v1241_v43, 2 }
 0x214   :  { %v462_v46 = vadd.f32 %v461_v44, %v460_v42 }
 0x215   :  { %v1243_v47 = vadd.f32 %v1242_v45, %v1241_v43 }
 0x216   :  { %v464_v48 = vmul.f32 0.14285715, %v462_v46 }
 0x217   :  { %v1244_v49 = vrot.slane %v1243_v47, 1 }
 0x218   :  { %v465_v50 = vsub.f32 %v452_v30, %v464_v48 }
 0x219   :  { %v1245_v51 = vadd.f32 %v1244_v49, %v1243_v47 }
 0x21a   :  { %v466_v52 = vmul.f32 %v465_v50, %v465_v50 }
 0x21b   :  { %v1246_v53 = vmul.f32 0.14285715, %v1245_v51 }
 0x21c   :  { %v467_v54 = vsel %vm455_vm4, %v466_v52, 0.0 }
 0x21d   :  { %v468_v55 = vrot.slane %v467_v54, 4  ;;  %v2488_v56 = vsub.f32 %v452_v30, %v1246_v53  ;;  %v2490_v57 = vsub.f32 %v454_v33, %v1246_v53 }
 0x21f   :  { %v469_v58 = vadd.f32 %v468_v55, %v467_v54  ;;  %v1249_v59 = vmul.f32 %v2488_v56, %v2488_v56  ;;  %v1250_v60 = vmul.f32 %v2490_v57, %v2490_v57 }
 0x221   :  { %v470_v61 = vrot.slane %v469_v58, 2  ;;  %v1253_v62 = vrot.slane %v1249_v59, 7  ;;  %v1254_v63 = vrot.slane %v1250_v60, 7 }
 0x223   :  { %v471_v0 = vadd.f32 %v470_v61, %v469_v58  ;;  %v1255_v2 = vsel %vm491_vm5, %v1253_v62, %v1254_v63 }
 0x224   :  { %v1257_v3 = vsel %vm455_vm4, %v1255_v2, 0.0 }
 0x225   :  { %v472_v4 = vrot.slane %v471_v0, 1  ;;  %v1258_v5 = vrot.slane %v1257_v3, 4 }
 0x227   :  { %v473_v6 = vadd.f32 %v472_v4, %v471_v0  ;;  %v1259_v7 = vadd.f32 %v1258_v5, %v1257_v3  ;;  %v2539_v3 = vld [vmem:[%s2922_s5] sm:$0xff]   ;;  %v2545_v4 = vld [vmem:[%s2922_s5 + $0x8] sm:$0xff]   ;;  %v2552_v5 = vld [vmem:[%s2922_s5 + $0x10] sm:$0xff]  }
 0x228   :  { %1910 = vmatpush3.bf16.msra.mxu0 %v2539_v3 }
 0x229   :  { %v475_v8 = vmul.f32 0.16666667, %v473_v6  ;;  %v1260_v9 = vrot.slane %v1259_v7, 2  ;;  %1911 = vmatprep.subr.bf16.mxu0 %v2170_v1  ;;  %v2559_v6 = vld [vmem:[%s2922_s5 + $0x18] sm:$0xff]  }
 0x22b   :  { %2146 = vrsqrt.f32 %v475_v8  ;;  %v1261_v10 = vadd.f32 %v1260_v9, %v1259_v7  ;;  %vm478_vm6 = vcmp.eq.f32.partialorder %v475_v8, inf  ;;  %v481_v25 = vand.u32 2147483648, %v475_v8  ;;  %v2566_v7 = vld [vmem:[%s2922_s5 + $0x20] sm:$0xff]   ;;  %v2579_v9 = vld [vmem:[%s2922_s5 + $0x28] sm:$0xff]  }
 0x22c   :  { %vm480_vm7 = vcmp.eq.f32.partialorder %v475_v8, 0.0  ;;  %1912 = vmatpush3.bf16.msra.mxu0 %v2545_v4 }
 0x22d   :  { %v1262_v11 = vrot.slane %v1261_v10, 1  ;;  %1913 = vmatprep.subr.bf16.mxu0 %v2170_v1 }
 0x22f   :  { %v1263_v12 = vadd.f32 %v1262_v11, %v1261_v10 }
 0x230   :  { %1914 = vmatpush3.bf16.msra.mxu0 %v2552_v5 }
 0x231   :  { %v1264_v13 = vmul.f32 0.16666667, %v1263_v12  ;;  %1915 = vmatprep.subr.bf16.mxu0 %v2170_v1 }
 0x233   :  { %2148 = vrsqrt.f32 %v1264_v13  ;;  %vm1267_vm8 = vcmp.eq.f32.partialorder %v1264_v13, inf  ;;  %v1270_v31 = vand.u32 2147483648, %v1264_v13  ;;  %vm1269_vm9 = vcmp.eq.f32.partialorder %v1264_v13, 0.0 }
 0x234   :  { %1916 = vmatpush3.bf16.msra.mxu0 %v2559_v6 }
 0x235   :  { %v2147_v23 = vpop.eup %2146  ;;  %1917 = vmatprep.subr.bf16.mxu0 %v2170_v1 }
 0x236   :  { %v477_v24 = vmul.f32 %v2147_v23, %v475_v8 }
 0x238   :  { %v479_v26 = vsel %vm478_vm6, %v475_v8, %v477_v24  ;;  %1918 = vmatpush3.bf16.msra.mxu0 %v2566_v7  ;;  %v2574_v8 = vld [vmem:[%s2923_s4] ss:$0 sm:$0xff] }
 0x239   :  { %v482_v27 = vsel %vm480_vm7, %v481_v25, %v479_v26  ;;  %1919 = vmatprep.subr.bf16.mxu0 %v2170_v1 }
 0x23a   :  { %v483_v28 = vadd.f32 1e-05, %v482_v27 }
 0x23c   :  { %2150 = vrcp.f32 %v483_v28  ;;  %1920 = vmatpush3.bf16.msra.mxu0 %v2579_v9 }
 0x23d   :  { %v2149_v29 = vpop.eup %2148  ;;  %1941 = vmatprep.subr.bf16.mxu0 %v2170_v1 }
 0x23e   :  { %v1266_v30 = vmul.f32 %v2149_v29, %v1264_v13 }
 0x240   :  { %v1268_v32 = vsel %vm1267_vm8, %v1264_v13, %v1266_v30  ;;  %vm1181_vm8 = vcmask 392192  }
 0x241   :  { %v1271_v33 = vsel %vm1269_vm9, %v1270_v31, %v1268_v32  ;;  %vm1231_vm9 = vcmask 474112  }
 0x242   :  { %v1272_v35 = vadd.f32 1e-05, %v1271_v33 }
 0x244   :  { %2152 = vrcp.f32 %v1272_v35 }
 0x246   :  { %v2151_v37 = vpop.eup %2150 }
 0x247   :  { %v485_v38 = vmul.f32 %v2151_v37, %v465_v50 }
 0x249   :  { %v487_v39 = vrot.slane %v485_v38, 6 }
 0x24b   :  { %v490_v40 = vsel %vm489_vm10, 0.0, %v487_v39  ;;  %v492_v41 = vsel %vm491_vm5, %v487_v39, 0.0 }
 0x24c   :  { %v494_v42 = vrot.slane %v490_v40, 1  ;;  %v507_v43 = vrot.slane %v490_v40, 3  ;;  %v508_v44 = vrot.slane %v492_v41, 3  ;;  %v515_v45 = vrot.slane %v492_v41, 4 }
 0x24d   :  { %v514_v46 = vrot.slane %v490_v40, 4  ;;  %v500_v47 = vrot.slane %v490_v40, 2  ;;  %v501_v48 = vrot.slane %v492_v41, 2  ;;  %v2598_v41 = vld [vmem:[%s2924_s7] sm:$0xff]  }
 0x24e   :  { %v2153_v49 = vpop.eup %2152  ;;  %495 = vrot.lane.b32.xlu0 %v494_v42, %s2173_s3  ;;  %v509_v50 = vsel %vm506_vm11, %v507_v43, %v508_v44  ;;  %v2604_v42 = vld [vmem:[%s2924_s7 + $0x8] sm:$0xff]   ;;  %v2611_v43 = vld [vmem:[%s2924_s7 + $0x10] sm:$0xff]   ;;  %v2618_v44 = vld [vmem:[%s2924_s7 + $0x18] sm:$0xff]  }
 0x24f   :  { %v1274_v51 = vmul.f32 %v2153_v49, %v2488_v56  ;;  %v2518_v52 = vmul.f32 %v2153_v49, %v2490_v57  ;;  %510 = vrot.lane.b32.xlu1 %v509_v50, %s2174_s28  ;;  %v516_v53 = vsel %vm99_vm1, %v514_v46, %v515_v45  ;;  %v502_v59 = vsel %vm499_vm12, %v500_v47, %v501_v48  ;;  %v2625_v45 = vld [vmem:[%s2924_s7 + $0x20] sm:$0xff]   ;;  %v2638_v47 = vld [vmem:[%s2924_s7 + $0x28] sm:$0xff]  }
 0x250   :  { %v525_v54 = vpack.c.bf16 %v516_v53, %v516_v53  ;;  %v2633_v46 = vld [vmem:[%s2925_s6] ss:$0 sm:$0xff] }
 0x251   :  { %v1278_v55 = vrot.slane %v1274_v51, 5  ;;  %v1279_v58 = vrot.slane %v2518_v52, 5 }
 0x252   :  { %1784 = vmatprep.mubr.msk.bf16.mxu1 %vm518_vm13, %v525_v54  ;;  %503 = vrot.lane.b32.xlu0 %v502_v59, %s2175_s29  ;;  %v2646_v59 = vld [vmem:[%s2926_s9] sm:$0xff]  }
 0x253   :  { %v2529_v56 = vsel %vm781_vm14, %v1278_v55, %v1279_v58 }
 0x2c0   :  { %v496_v57 = vpop.permute.xlu0 %495 }
 0x2c1   :  { %v519_v60 = vsel %vm518_vm13, %v490_v40, %v496_v57  ;;  %v511_v62 = vpop.permute.xlu1 %510 }
 0x2c4   :  { %v504_v61 = vpop.permute.xlu0 %503 }
 0x2c5   :  { %v521_v63 = vsel %vm520_vm15, %v519_v60, %v504_v61 }
 0x2c6   :  { %v523_v0 = vsel %vm522_vm0, %v521_v63, %v511_v62 }
 0x2c7   :  { %v524_v2 = vpack.c.bf16 %v523_v0, %v523_v0 }
 0x2c9   :  { %649 = vmatmul.mubr.bf16.vlgmr.msra.gmra.mrb[4].mxu1 %v524_v2  ;;  %v2654_v2 = vsel %vm489_vm10, 0.0, %v2529_v56 }
 0x2ca   :  { %1937 = vmatprep.mubr.msk.bf16.mxu1 %vm2171_vm3, %v2170_v1  ;;  %1926 = vmatpush3.bf16.msra.mxu1 %v2598_v41 }
 0x2cb   :  { %1927 = vmatprep.subr.bf16.mxu1 %v2170_v1 }
 0x2ce   :  { %1928 = vmatpush3.bf16.msra.mxu1 %v2604_v42 }
 0x2cf   :  { %1929 = vmatprep.subr.bf16.mxu1 %v2170_v1 }
 0x2d2   :  { %1930 = vmatpush3.bf16.msra.mxu1 %v2611_v43 }
 0x2d3   :  { %1931 = vmatprep.subr.bf16.mxu1 %v2170_v1 }
 0x2d6   :  { %1932 = vmatpush3.bf16.msra.mxu1 %v2618_v44 }
 0x2d7   :  { %1933 = vmatprep.subr.bf16.mxu1 %v2170_v1 }
 0x2da   :  { %1934 = vmatpush3.bf16.msra.mxu1 %v2625_v45 }
 0x2db   :  { %1935 = vmatprep.subr.bf16.mxu1 %v2170_v1 }
 0x2de   :  { %1936 = vmatpush3.bf16.msra.mxu1 %v2638_v47 }
 0x2df   :  { %1955 = vmatprep.subr.bf16.mxu1 %v2170_v1 }
 0x39c   :  { %v650_v10 = vpop.f32.mrb[4].mxu1 }
 0x39d   :  { %v651_v11 = vadd.f32 %v2574_v8, %v650_v10  ;;  %v652_v12 = vpop.f32.mrb[5].mxu1 }
 0x39e   :  { %v653_v13 = vpop.f32.mrb[6].mxu1  ;;  %v2663_v12 = vsel %vm491_vm5, %v1279_v58, 0.0 }
 0x39f   :  { %v656_v23 = vmax.f32 %v651_v11, 0.0  ;;  %v654_v24 = vpop.f32.mrb[7].mxu1  ;;  %v1286_v13 = vrot.slane %v2654_v2, 1  ;;  %v1298_v56 = vrot.slane %v2663_v12, 3 }
 0x3a1   :  { %v658_v25 = vrot.slane %v656_v23, 6  ;;  %v1297_v23 = vrot.slane %v2654_v2, 3 }
 0x3a3   :  { %v660_v26 = vsel %vm489_vm10, 0.0, %v658_v25  ;;  %v661_v27 = vsel %vm491_vm5, %v658_v25, 0.0  ;;  %v1299_v24 = vsel %vm506_vm11, %v1297_v23, %v1298_v56 }
 0x3a4   :  { %v664_v28 = vrot.slane %v660_v26, 2  ;;  %v665_v29 = vrot.slane %v661_v27, 2  ;;  %v670_v30 = vrot.slane %v660_v26, 4  ;;  %v671_v31 = vrot.slane %v661_v27, 4 }
 0x3a6   :  { %v672_v32 = vsel %vm99_vm1, %v670_v30, %v671_v31  ;;  %v666_v33 = vsel %vm499_vm12, %v664_v28, %v665_v29  ;;  %v2679_v28 = vld [vmem:[%s2926_s9 + $0x8] sm:$0xff]   ;;  %v2686_v29 = vld [vmem:[%s2927_s8] ss:$0 sm:$0xff] }
 0x3a7   :  { %673 = vrot.lane.b32.xlu0 %v672_v32, %s2175_s29  ;;  %667 = vrot.lane.b32.xlu1 %v666_v33, %s2173_s3 }
 0x419   :  { %v674_v35 = vpop.permute.xlu0 %673  ;;  %v668_v37 = vpop.permute.xlu1 %667 }
 0x41a   :  { %v676_v38 = vsel %vm518_vm13, %v660_v26, %v668_v37 }
 0x41b   :  { %v677_v39 = vsel %vm520_vm15, %v676_v38, %v674_v35 }
 0x41c   :  { %v678_v40 = vpack.c.bf16 %v677_v39, %v677_v39  ;;  %v2699_v39 = vld [vmem:[%s2928_s11] sm:$0xff]  }
 0x41e   :  { %1922 = vmatmul.mubr.msk.bf16.vlgmr.msra.gmra.mrb[4].mxu0 %vm522_vm0, %v678_v40  ;;  %v2706_v40 = vld [vmem:[%s2929_s10] ss:$0 sm:$0xff] }
 0x41f   :  { %1945 = vmatprep.mubr.msk.bf16.mxu0 %vm2171_vm3, %v2170_v1  ;;  %1942 = vmatpush3.bf16.msra.mxu0 %v2646_v59 }
 0x420   :  { %1943 = vmatprep.subr.bf16.mxu0 %v2170_v1 }
 0x423   :  { %1944 = vmatpush3.bf16.msra.mxu0 %v2679_v28 }
 0x424   :  { %1949 = vmatprep.subr.bf16.mxu0 %v2170_v1 }
 0x4f1   :  { %v771_v48 = vpop.f32.mrb[4].mxu0 }
 0x4f2   :  { %v772_v49 = vadd.f32 %v2633_v46, %v771_v48  ;;  %v1923_v50 = vpop.f32.mrb[5].mxu0 }
 0x4f3   :  { %v774_v51 = vpop.f32.mrb[6].mxu0 }
 0x4f4   :  { %v777_v53 = vmax.f32 %v772_v49, 0.0  ;;  %v1924_v54 = vpop.f32.mrb[7].mxu0 }
 0x4f6   :  { %v779_v55 = vrot.slane %v777_v53, 5 }
 0x4f8   :  { %v782_v57 = vsel %vm781_vm14, 0.0, %v779_v55  ;;  %v783_v60 = vsel %vm489_vm10, %v779_v55, 0.0 }
 0x4f9   :  { %v786_v61 = vrot.slane %v782_v57, 3  ;;  %v787_v62 = vrot.slane %v783_v60, 3  ;;  %v792_v63 = vrot.slane %v782_v57, 6  ;;  %v793_v0 = vrot.slane %v783_v60, 6  ;;  %v2721_v60 = vld [vmem:[%s2930_s13 + $0x8] sm:$0xff]  }
 0x4fb   :  { %v794_v10 = vsel %vm489_vm10, %v792_v63, %v793_v0  ;;  %v788_v11 = vsel %vm506_vm11, %v786_v61, %v787_v62  ;;  %v2728_v61 = vld [vmem:[%s2930_s13 + $0x10] sm:$0xff]   ;;  %v2735_v62 = vld [vmem:[%s2930_s13 + $0x18] sm:$0xff]   ;;  %v2743_v63 = vld [vmem:[%s2931_s12] ss:$0 sm:$0xff] }
 0x4fc   :  { %795 = vrot.lane.b32.xlu0 %v794_v10, %s2175_s29  ;;  %789 = vrot.lane.b32.xlu1 %v788_v11, %s2173_s3 }
 0x500   :  { %1287 = vrot.lane.b32.xlu0 %v1286_v13, %s2173_s3 }
 0x504   :  { %1300 = vrot.lane.b32.xlu0 %v1299_v24, %s2174_s28 }
 0x56e   :  { %v796_v25 = vpop.permute.xlu0 %795  ;;  %v790_v26 = vpop.permute.xlu1 %789 }
 0x56f   :  { %v798_v27 = vsel %vm518_vm13, %v782_v57, %v790_v26  ;;  %v2715_v57 = vld [vmem:[%s2930_s13] sm:$0xff]  }
 0x570   :  { %v799_v52 = vsel %vm520_vm15, %v798_v27, %v796_v25 }
 0x571   :  { %v800_v58 = vpack.c.bf16 %v799_v52, %v799_v52 }
 0x573   :  { %1938 = vmatmul.mubr.msk.bf16.vlgmr.msra.gmra.mrb[8].mxu1 %vm522_vm0, %v800_v58 }
 0x574   :  { %1963 = vmatprep.mubr.msk.bf16.mxu1 %vm2171_vm3, %v2170_v1  ;;  %1956 = vmatpush3.bf16.msra.mxu1 %v2715_v57 }
 0x575   :  { %1957 = vmatprep.subr.bf16.mxu1 %v2170_v1 }
 0x578   :  { %1958 = vmatpush3.bf16.msra.mxu1 %v2721_v60 }
 0x579   :  { %1959 = vmatprep.subr.bf16.mxu1 %v2170_v1 }
 0x57c   :  { %1960 = vmatpush3.bf16.msra.mxu1 %v2728_v61 }
 0x57d   :  { %1961 = vmatprep.subr.bf16.mxu1 %v2170_v1 }
 0x580   :  { %1962 = vmatpush3.bf16.msra.mxu1 %v2735_v62 }
 0x581   :  { %1315 = vmatprep.subr.bf16.mxu1 %v2172_v14 }
 0x646   :  { %v893_v30 = vpop.f32.mrb[8].mxu1 }
 0x647   :  { %v894_v31 = vadd.f32 %v2686_v29, %v893_v30  ;;  %v1939_v32 = vpop.f32.mrb[9].mxu1 }
 0x648   :  { %v896_v33 = vpop.f32.mrb[10].mxu1 }
 0x649   :  { %v2689_v35 = vmax.f32 %v894_v31, 0.0  ;;  %v1940_v37 = vpop.f32.mrb[11].mxu1 }
 0x64b   :  { %v900_v38 = vpack.c.bf16 %v2689_v35, %v2689_v35 }
 0x64d   :  { %1946 = vmatmul.mubr.msk.bf16.vlgmr.msra.gmra.mrb[8].mxu0 %vm518_vm13, %v900_v38 }
 0x64e   :  { %1951 = vmatprep.mubr.msk.bf16.mxu0 %vm2171_vm3, %v2170_v1  ;;  %1950 = vmatpush3.bf16.msra.mxu0 %v2699_v39 }
 0x64f   :  { %1967 = vmatprep.subr.bf16.mxu0 %v2170_v1 }
 0x720   :  { %v961_v48 = vpop.f32.mrb[8].mxu0 }
 0x721   :  { %v962_v49 = vadd.f32 %v2706_v40, %v961_v48  ;;  %v1947_v50 = vpop.f32.mrb[9].mxu0 }
 0x722   :  { %v964_v51 = vpop.f32.mrb[10].mxu0 }
 0x723   :  { %2154 = vtanh.f32 %v962_v49  ;;  %v1948_v53 = vpop.f32.mrb[11].mxu0 }
 0x72d   :  { %v2155_v54 = vpop.eup %2154 }
 0x72e   :  { %v968_v55 = vpack.c.bf16 %v2155_v54, %v2155_v54 }
 0x730   :  { %1952 = vmatmul.mubr.msk.bf16.vlgmr.msra.gmra.mrb[12].mxu0 %vm984_vm2, %v968_v55 }
 0x731   :  { %1973 = vmatprep.mubr.msk.bf16.mxu0 %vm2171_vm3, %v2170_v1 }
 0x803   :  { %v1022_v0 = vpop.f32.mrb[12].mxu0 }
 0x804   :  { %v1023_v10 = vadd.f32 %v2743_v63, %v1022_v0  ;;  %v1953_v11 = vpop.f32.mrb[13].mxu0 }
 0x805   :  { %v1025_v13 = vpop.f32.mrb[14].mxu0 }
 0x806   :  { %v1028_v23 = vsel %vm455_vm4, %v1023_v10, -inf  ;;  %v1954_v56 = vpop.f32.mrb[15].mxu0 }
 0x807   :  { %v1029_v24 = vrot.slane %v1028_v23, 4 }
 0x809   :  { %v1030_v25 = vmax.f32 %v1028_v23, %v1029_v24 }
 0x80b   :  { %v1031_v26 = vrot.slane %v1030_v25, 2 }
 0x80d   :  { %v1032_v27 = vmax.f32 %v1030_v25, %v1031_v26 }
 0x80f   :  { %v1033_v52 = vrot.slane %v1032_v27, 1 }
 0x811   :  { %v1034_v58 = vmax.f32 %v1032_v27, %v1033_v52 }
 0x813   :  { %v1035_v30 = vsub.f32 %v1023_v10, %v1034_v58 }
 0x815   :  { %v1036_v31 = vmul.f32 1.442695, %v1035_v30 }
 0x817   :  { %2156 = vpow2.f32 %v1036_v31 }
 0x821   :  { %v2157_v32 = vpop.eup %2156 }
 0x822   :  { %v1038_v33 = vsel %vm455_vm4, %v2157_v32, 0.0 }
 0x823   :  { %v1039_v37 = vrot.slane %v1038_v33, 4 }
 0x825   :  { %v1040_v38 = vadd.f32 %v1039_v37, %v1038_v33 }
 0x827   :  { %v1041_v48 = vrot.slane %v1040_v38, 2 }
 0x829   :  { %v1042_v49 = vadd.f32 %v1041_v48, %v1040_v38 }
 0x82b   :  { %v1043_v50 = vrot.slane %v1042_v49, 1 }
 0x82d   :  { %v1044_v51 = vadd.f32 %v1043_v50, %v1042_v49 }
 0x82f   :  { %2158 = vrcp.f32 %v1044_v51 }
 0x839   :  { %v2159_v53 = vpop.eup %2158 }
 0x83a   :  { %v1046_v54 = vmul.f32 %v2159_v53, %v2157_v32  ;;  %v1291_v53 = vrot.slane %v2654_v2, 2 }
 0x83c   :  { %v1047_v55 = vmul.f32 %v1046_v54, %v2689_v35  ;;  %v1292_v54 = vrot.slane %v2663_v12, 2 }
 0x83e   :  { %v1048_v0 = vsel %vm455_vm4, %v1047_v55, 0.0  ;;  %v1055_v10 = vmul.f32 %v1047_v55, %v2689_v35  ;;  %v1293_v55 = vsel %vm499_vm12, %v1291_v53, %v1292_v54 }
 0x83f   :  { %v1049_v11 = vrot.slane %v1048_v0, 4 }
 0x840   :  { %v1056_v13 = vsel %vm455_vm4, %v1055_v10, 0.0  ;;  %v2766_v10 = vld [vmem:[%s2932_s15 + $0x8] sm:$0xff]  }
 0x841   :  { %v1050_v23 = vadd.f32 %v1049_v11, %v1048_v0  ;;  %v1057_v56 = vrot.slane %v1056_v13, 4  ;;  %v2760_v0 = vld [vmem:[%s2932_s15] sm:$0xff]   ;;  %v1304_v11 = vrot.slane %v2663_v12, 4 }
 0x842   :  { %1968 = vmatpush3.bf16.msra.mxu0 %v2760_v0 }
 0x843   :  { %v1051_v24 = vrot.slane %v1050_v23, 2  ;;  %v1058_v25 = vadd.f32 %v1057_v56, %v1056_v13  ;;  %1969 = vmatprep.subr.bf16.mxu0 %v2170_v1  ;;  %v1303_v13 = vrot.slane %v2654_v2, 4 }
 0x845   :  { %v1052_v26 = vadd.f32 %v1051_v24, %v1050_v23  ;;  %v1059_v27 = vrot.slane %v1058_v25, 2  ;;  %v1305_v56 = vsel %vm99_vm1, %v1303_v13, %v1304_v11 }
 0x846   :  { %1970 = vmatpush3.bf16.msra.mxu0 %v2766_v10 }
 0x847   :  { %v1053_v52 = vrot.slane %v1052_v26, 1  ;;  %v1060_v58 = vadd.f32 %v1059_v27, %v1058_v25  ;;  %1971 = vmatprep.subr.bf16.mxu0 %v2170_v1 }
 0x849   :  { %v1054_v30 = vadd.f32 %v1053_v52, %v1052_v26  ;;  %v1061_v31 = vrot.slane %v1060_v58, 1  ;;  %v1311_v26 = vpack.c.bf16 %v1305_v56, %v1305_v56 }
 0x84b   :  { %v1062_v32 = vadd.f32 %v1061_v31, %v1060_v58  ;;  %v1063_v33 = vmul.f32 %v1054_v30, %v1054_v30 }
 0x84d   :  { %v1064_v37 = vsub.f32 %v1062_v32, %v1063_v33 }
 0x84f   :  { %v1065_v38 = vmax.f32 %v1064_v37, 1e-08 }
 0x851   :  { %2160 = vrsqrt.f32 %v1065_v38  ;;  %vm1068_vm6 = vcmp.eq.f32.partialorder %v1065_v38, inf  ;;  %v1071_v49 = vand.u32 2147483648, %v1065_v38  ;;  %vm1070_vm7 = vcmp.eq.f32.partialorder %v1065_v38, 0.0 }
 0x85b   :  { %v2161_v48 = vpop.eup %2160 }
 0x85c   :  { %v1067_v35 = vmul.f32 %v2161_v48, %v1065_v38 }
 0x85e   :  { %v1069_v50 = vsel %vm1068_vm6, %v1065_v38, %v1067_v35 }
 0x85f   :  { %v1072_v51 = vsel %vm1070_vm7, %v1071_v49, %v1069_v50 }
 0x860   :  { %1074 = vrot.lane.b32.xlu1 %v1072_v51, %s2173_s3 }
 0x864   :  { %1294 = vrot.lane.b32.xlu1 %v1293_v55, %s2175_s29 }
 0x8d2   :  { %v1075_v23 = vpop.permute.xlu1 %1074 }
 0x8d3   :  { %v1077_v24 = vsel %vm518_vm13, %v1054_v30, %v1075_v23 }
 0x8d4   :  { %v1078_v25 = vpack.c.bf16 %v1077_v24, %v1077_v24 }
 0x8d6   :  { %1964 = vmatmul.mubr.msk.bf16.vlgmr.msra.gmra.mrb[12].mxu1 %vm520_vm15, %v1078_v25 }
 0x8d7   :  { %1316 = vmatpush1.bf16.msra.mxu1 %v2431_v15  ;;  %1817 = vmatprep.mubr.msk.bf16.mxu1 %vm518_vm13, %v1311_v26  ;;  %v1288_v15 = vpop.permute.xlu0 %1287 }
 0x8d8   :  { %1317 = vmatprep.subr.bf16.mxu1 %v2172_v14 }
 0x8db   :  { %1318 = vmatpush1.bf16.msra.mxu1 %v2437_v16  ;;  %v1295_v16 = vpop.permute.xlu1 %1294 }
 0x8dc   :  { %1319 = vmatprep.subr.bf16.mxu1 %v2172_v14 }
 0x8df   :  { %1320 = vmatpush1.bf16.msra.mxu1 %v2444_v17  ;;  %v1307_v17 = vsel %vm518_vm13, %v2654_v2, %v1288_v15 }
 0x8e0   :  { %1321 = vmatprep.subr.bf16.mxu1 %v2172_v14 }
 0x8e3   :  { %1322 = vmatpush1.bf16.msra.mxu1 %v2451_v18  ;;  %v1308_v18 = vsel %vm520_vm15, %v1307_v17, %v1295_v16 }
 0x8e4   :  { %1323 = vmatprep.subr.bf16.mxu1 %v2172_v14 }
 0x8e7   :  { %1324 = vmatpush1.bf16.msra.mxu1 %v2458_v19  ;;  %v1301_v19 = vpop.permute.xlu0 %1300 }
 0x8e8   :  { %1325 = vmatprep.subr.bf16.mxu1 %v2172_v14 }
 0x8eb   :  { %1326 = vmatpush1.bf16.msra.mxu1 %v2465_v20  ;;  %v1309_v20 = vsel %vm522_vm0, %v1308_v18, %v1301_v19 }
 0x8ec   :  { %1327 = vmatprep.subr.bf16.mxu1 %v2172_v14 }
 0x8ef   :  { %1328 = vmatpush1.bf16.msra.mxu1 %v2472_v21  ;;  %v1310_v21 = vpack.c.bf16 %v1309_v20, %v1309_v20 }
 0x8f0   :  { %1329 = vmatprep.subr.bf16.mxu1 %v2172_v14 }
 0x8f3   :  { %1330 = vmatpush1.bf16.msra.mxu1 %v2479_v22  ;;  %v2817_v22 = vld [vmem:[%s2933_s14] sm:$0x1]  ;;  %s2176_s14 = smov 10  }
 0x8f4   :  { %1331 = vmatprep.subr.bf16.mxu1 %v2172_v14 }
 0x8f7   :  { %1332 = vmatpush1.bf16.msra.mxu1 %v2501_v34 }
 0x8f8   :  { %1333 = vmatprep.subr.bf16.mxu1 %v2172_v14  ;;  %v2810_v14 = vld [vmem:[%s2932_s15 + $0x10] sm:$0xff]  }
 0x8f9   :  { %1972 = vmatpush3.bf16.msra.mxu0 %v2810_v14 }
 0x8fa   :  { %1977 = vmatprep.subr.bf16.mxu0 %v2170_v1 }
 0x8fb   :  { %1334 = vmatpush1.bf16.msra.mxu1 %v2508_v36 }
 0x8fc   :  { %2009 = vmatprep.subr.bf16.mxu1 %v2170_v1 }
 0x8fe   :  { %1348 = vmatmul.mubr.bf16.vlgmr.msra.gmra.mrb[16].mxu1 %v1310_v21 }
 0x8ff   :  { %2010 = vmatpush3.bf16.msra.mxu1 %v2646_v59  ;;  %2013 = vmatprep.mubr.msk.bf16.mxu1 %vm2171_vm3, %v2170_v1 }
 0x900   :  { %2011 = vmatprep.subr.bf16.mxu1 %v2170_v1 }
 0x903   :  { %2012 = vmatpush3.bf16.msra.mxu1 %v2679_v28 }
 0x904   :  { %2017 = vmatprep.subr.bf16.mxu1 %v2170_v1 }
 0x9a9   :  { %v1149_v34 = vpop.f32.mrb[12].mxu1 }
 0x9aa   :  { %v2820_v36 = vadd.f32 %v1149_v34, %v2817_v22  ;;  %v1965_v59 = vpop.f32.mrb[13].mxu1 }
 0x9ab   :  { %v1152_v2 = vpop.f32.mrb[14].mxu1 }
 0x9ac   :  { %v1155_v12 = vpack.c.bf16 %v2820_v36, %v2820_v36  ;;  %v1966_v28 = vpop.f32.mrb[15].mxu1 }
 0x9ae   :  { %1974 = vmatmul.mubr.msk.bf16.vlgmr.msra.gmra.mrb[16].mxu0 %vm1181_vm8, %v1155_v12 }
 0x9af   :  { %1978 = vmatpush3.bf16.msra.mxu0 %v2539_v3  ;;  %1989 = vmatprep.mubr.msk.bf16.mxu0 %vm2171_vm3, %v2170_v1 }
 0x9b0   :  { %1979 = vmatprep.subr.bf16.mxu0 %v2170_v1 }
 0x9b3   :  { %1980 = vmatpush3.bf16.msra.mxu0 %v2545_v4 }
 0x9b4   :  { %1981 = vmatprep.subr.bf16.mxu0 %v2170_v1 }
 0x9b7   :  { %1982 = vmatpush3.bf16.msra.mxu0 %v2552_v5 }
 0x9b8   :  { %1983 = vmatprep.subr.bf16.mxu0 %v2170_v1 }
 0x9bb   :  { %1984 = vmatpush3.bf16.msra.mxu0 %v2559_v6 }
 0x9bc   :  { %1985 = vmatprep.subr.bf16.mxu0 %v2170_v1 }
 0x9bf   :  { %1986 = vmatpush3.bf16.msra.mxu0 %v2566_v7 }
 0x9c0   :  { %1987 = vmatprep.subr.bf16.mxu0 %v2170_v1 }
 0x9c3   :  { %1988 = vmatpush3.bf16.msra.mxu0 %v2579_v9 }
 0x9c4   :  { %1993 = vmatprep.subr.bf16.mxu0 %v2170_v1 }
 0x9d1   :  { %v1349_v3 = vpop.f32.mrb[16].mxu1 }
 0x9d2   :  { %v1350_v4 = vadd.f32 %v2574_v8, %v1349_v3  ;;  %v1351_v27 = vpop.f32.mrb[17].mxu1 }
 0x9d3   :  { %v1352_v52 = vpop.f32.mrb[18].mxu1 }
 0x9d4   :  { %v1355_v5 = vmax.f32 %v1350_v4, 0.0  ;;  %v1353_v58 = vpop.f32.mrb[19].mxu1 }
 0x9d6   :  { %v1357_v30 = vrot.slane %v1355_v5, 6 }
 0x9d8   :  { %v1359_v6 = vsel %vm489_vm10, 0.0, %v1357_v30  ;;  %v1360_v31 = vsel %vm491_vm5, %v1357_v30, 0.0 }
 0x9d9   :  { %v1363_v32 = vrot.slane %v1359_v6, 2  ;;  %v1364_v7 = vrot.slane %v1360_v31, 2  ;;  %v1369_v33 = vrot.slane %v1359_v6, 4  ;;  %v1370_v37 = vrot.slane %v1360_v31, 4 }
 0x9db   :  { %v1371_v9 = vsel %vm99_vm1, %v1369_v33, %v1370_v37  ;;  %v1365_v38 = vsel %vm499_vm12, %v1363_v32, %v1364_v7 }
 0x9dc   :  { %1372 = vrot.lane.b32.xlu0 %v1371_v9, %s2175_s29  ;;  %1366 = vrot.lane.b32.xlu1 %v1365_v38, %s2173_s3 }
 0xa4e   :  { %v1373_v8 = vpop.permute.xlu0 %1372  ;;  %v1367_v48 = vpop.permute.xlu1 %1366 }
 0xa4f   :  { %v1375_v35 = vsel %vm518_vm13, %v1359_v6, %v1367_v48 }
 0xa50   :  { %v1376_v49 = vsel %vm520_vm15, %v1375_v35, %v1373_v8 }
 0xa51   :  { %v1377_v50 = vpack.c.bf16 %v1376_v49, %v1376_v49 }
 0xa53   :  { %1990 = vmatmul.mubr.msk.bf16.vlgmr.msra.gmra.mrb[20].mxu0 %vm522_vm0, %v1377_v50 }
 0xa54   :  { %1994 = vmatpush3.bf16.msra.mxu0 %v2598_v41  ;;  %2005 = vmatprep.mubr.msk.bf16.mxu0 %vm2171_vm3, %v2170_v1 }
 0xa55   :  { %1995 = vmatprep.subr.bf16.mxu0 %v2170_v1 }
 0xa58   :  { %1996 = vmatpush3.bf16.msra.mxu0 %v2604_v42 }
 0xa59   :  { %1997 = vmatprep.subr.bf16.mxu0 %v2170_v1 }
 0xa5c   :  { %1998 = vmatpush3.bf16.msra.mxu0 %v2611_v43 }
 0xa5d   :  { %1999 = vmatprep.subr.bf16.mxu0 %v2170_v1 }
 0xa60   :  { %2000 = vmatpush3.bf16.msra.mxu0 %v2618_v44 }
 0xa61   :  { %2001 = vmatprep.subr.bf16.mxu0 %v2170_v1 }
 0xa64   :  { %2002 = vmatpush3.bf16.msra.mxu0 %v2625_v45 }
 0xa65   :  { %2003 = vmatprep.subr.bf16.mxu0 %v2170_v1 }
 0xa68   :  { %2004 = vmatpush3.bf16.msra.mxu0 %v2638_v47 }
 0xa69   :  { %2023 = vmatprep.subr.bf16.mxu0 %v2170_v1 }
 0xa81   :  { %v2863_v41 = vpop.f32.mrb[16].mxu0 }
 0xa82   :  { %v1975_v42 = vpop.f32.mrb[17].mxu0 }
 0xa83   :  { %v1222_v51 = vpop.f32.mrb[18].mxu0 }
 0xa84   :  { %v1976_v53 = vpop.f32.mrb[19].mxu0 }
 0xb26   :  { %v1415_v43 = vpop.f32.mrb[20].mxu0 }
 0xb27   :  { %v1416_v54 = vadd.f32 %v2633_v46, %v1415_v43  ;;  %v1991_v55 = vpop.f32.mrb[21].mxu0 }
 0xb28   :  { %v1418_v44 = vpop.f32.mrb[22].mxu0 }
 0xb29   :  { %v1421_v11 = vmax.f32 %v1416_v54, 0.0  ;;  %v1992_v13 = vpop.f32.mrb[23].mxu0 }
 0xb2b   :  { %v1423_v23 = vrot.slane %v1421_v11, 5 }
 0xb2d   :  { %v1425_v45 = vsel %vm781_vm14, 0.0, %v1423_v23  ;;  %v1426_v56 = vsel %vm489_vm10, %v1423_v23, 0.0 }
 0xb2e   :  { %v1429_v47 = vrot.slane %v1425_v45, 3  ;;  %v1430_v24 = vrot.slane %v1426_v56, 3  ;;  %v1435_v25 = vrot.slane %v1425_v45, 6  ;;  %v1436_v26 = vrot.slane %v1426_v56, 6 }
 0xb30   :  { %v1437_v15 = vsel %vm489_vm10, %v1435_v25, %v1436_v26  ;;  %v1431_v16 = vsel %vm506_vm11, %v1429_v47, %v1430_v24 }
 0xb31   :  { %1438 = vrot.lane.b32.xlu0 %v1437_v15, %s2175_s29  ;;  %1432 = vrot.lane.b32.xlu1 %v1431_v16, %s2173_s3 }
 0xba3   :  { %v1439_v46 = vpop.permute.xlu0 %1438  ;;  %v1433_v17 = vpop.permute.xlu1 %1432 }
 0xba4   :  { %v1441_v18 = vsel %vm518_vm13, %v1425_v45, %v1433_v17 }
 0xba5   :  { %v1442_v19 = vsel %vm520_vm15, %v1441_v18, %v1439_v46 }
 0xba6   :  { %v1443_v20 = vpack.c.bf16 %v1442_v19, %v1442_v19 }
 0xba8   :  { %2006 = vmatmul.mubr.msk.bf16.vlgmr.msra.gmra.mrb[24].mxu0 %vm522_vm0, %v1443_v20 }
 0xba9   :  { %2024 = vmatpush3.bf16.msra.mxu0 %v2715_v57  ;;  %2031 = vmatprep.mubr.msk.bf16.mxu0 %vm2171_vm3, %v2170_v1 }
 0xbaa   :  { %2025 = vmatprep.subr.bf16.mxu0 %v2170_v1 }
 0xbad   :  { %2026 = vmatpush3.bf16.msra.mxu0 %v2721_v60 }
 0xbae   :  { %2027 = vmatprep.subr.bf16.mxu0 %v2170_v1 }
 0xbb1   :  { %2028 = vmatpush3.bf16.msra.mxu0 %v2728_v61 }
 0xbb2   :  { %2029 = vmatprep.subr.bf16.mxu0 %v2170_v1 }
 0xbb5   :  { %2030 = vmatpush3.bf16.msra.mxu0 %v2735_v62 }
 0xc7b   :  { %v1481_v21 = vpop.f32.mrb[24].mxu0 }
 0xc7c   :  { %v1482_v34 = vadd.f32 %v2686_v29, %v1481_v21  ;;  %v2007_v59 = vpop.f32.mrb[25].mxu0 }
 0xc7d   :  { %v1484_v57 = vpop.f32.mrb[26].mxu0 }
 0xc7e   :  { %v1487_v2 = vmax.f32 %v1482_v34, 0.0  ;;  %v2008_v12 = vpop.f32.mrb[27].mxu0 }
 0xc80   :  { %v1488_v28 = vpack.c.bf16 %v1487_v2, %v1487_v2 }
 0xc82   :  { %2014 = vmatmul.mubr.msk.bf16.vlgmr.msra.gmra.mrb[20].mxu1 %vm518_vm13, %v1488_v28 }
 0xc83   :  { %2018 = vmatpush3.bf16.msra.mxu1 %v2699_v39  ;;  %2019 = vmatprep.mubr.msk.bf16.mxu1 %vm2171_vm3, %v2170_v1 }
 0xc84   :  { %2035 = vmatprep.subr.bf16.mxu1 %v2170_v1 }
 0xd55   :  { %v1526_v60 = vpop.f32.mrb[20].mxu1 }
 0xd56   :  { %v1527_v61 = vadd.f32 %v2706_v40, %v1526_v60  ;;  %v2015_v62 = vpop.f32.mrb[21].mxu1 }
 0xd57   :  { %v1529_v3 = vpop.f32.mrb[22].mxu1 }
 0xd58   :  { %2162 = vtanh.f32 %v1527_v61  ;;  %v2016_v29 = vpop.f32.mrb[23].mxu1 }
 0xd62   :  { %v2163_v4 = vpop.eup %2162 }
 0xd63   :  { %v1533_v27 = vpack.c.bf16 %v2163_v4, %v2163_v4 }
 0xd65   :  { %2020 = vmatmul.mubr.msk.bf16.vlgmr.msra.gmra.mrb[24].mxu1 %vm984_vm2, %v1533_v27 }
 0xd66   :  { %2036 = vmatpush3.bf16.msra.mxu1 %v2760_v0  ;;  %2041 = vmatprep.mubr.msk.bf16.mxu1 %vm2171_vm3, %v2170_v1 }
 0xd67   :  { %2037 = vmatprep.subr.bf16.mxu1 %v2170_v1 }
 0xd6a   :  { %2038 = vmatpush3.bf16.msra.mxu1 %v2766_v10 }
 0xd6b   :  { %2039 = vmatprep.subr.bf16.mxu1 %v2170_v1 }
 0xd6e   :  { %2040 = vmatpush3.bf16.msra.mxu1 %v2810_v14 }
 0xe38   :  { %v1571_v39 = vpop.f32.mrb[24].mxu1 }
 0xe39   :  { %v1572_v40 = vadd.f32 %v2743_v63, %v1571_v39  ;;  %v2021_v52 = vpop.f32.mrb[25].mxu1 }
 0xe3a   :  { %v1574_v5 = vpop.f32.mrb[26].mxu1 }
 0xe3b   :  { %v1577_v58 = vsel %vm455_vm4, %v1572_v40, -inf  ;;  %v2022_v30 = vpop.f32.mrb[27].mxu1 }
 0xe3c   :  { %v1578_v0 = vrot.slane %v1577_v58, 4 }
 0xe3e   :  { %v1579_v6 = vmax.f32 %v1577_v58, %v1578_v0 }
 0xe40   :  { %v1580_v31 = vrot.slane %v1579_v6, 2 }
 0xe42   :  { %v1581_v32 = vmax.f32 %v1579_v6, %v1580_v31 }
 0xe44   :  { %v1582_v7 = vrot.slane %v1581_v32, 1 }
 0xe46   :  { %v1583_v33 = vmax.f32 %v1581_v32, %v1582_v7 }
 0xe48   :  { %v1584_v37 = vsub.f32 %v1572_v40, %v1583_v33 }
 0xe4a   :  { %v1585_v10 = vmul.f32 1.442695, %v1584_v37 }
 0xe4c   :  { %2164 = vpow2.f32 %v1585_v10 }
 0xe56   :  { %v2165_v1 = vpop.eup %2164 }
 0xe57   :  { %v1587_v14 = vsel %vm455_vm4, %v2165_v1, 0.0 }
 0xe58   :  { %v1588_v9 = vrot.slane %v1587_v14, 4 }
 0xe5a   :  { %v1589_v38 = vadd.f32 %v1588_v9, %v1587_v14 }
 0xe5c   :  { %v1590_v63 = vrot.slane %v1589_v38, 2 }
 0xe5e   :  { %v1591_v8 = vadd.f32 %v1590_v63, %v1589_v38 }
 0xe60   :  { %v1592_v48 = vrot.slane %v1591_v8, 1 }
 0xe62   :  { %v1593_v35 = vadd.f32 %v1592_v48, %v1591_v8 }
 0xe64   :  { %2166 = vrcp.f32 %v1593_v35 }
 0xe6e   :  { %v2167_v49 = vpop.eup %2166 }
 0xe6f   :  { %v1595_v50 = vmul.f32 %v2167_v49, %v2165_v1 }
 0xe71   :  { %v1596_v42 = vmul.f32 %v1595_v50, %v1487_v2 }
 0xe73   :  { %v1597_v51 = vsel %vm455_vm4, %v1596_v42, 0.0  ;;  %v1604_v53 = vmul.f32 %v1596_v42, %v1487_v2 }
 0xe74   :  { %v1598_v43 = vrot.slane %v1597_v51, 4 }
 0xe75   :  { %v1605_v54 = vsel %vm455_vm4, %v1604_v53, 0.0  ;;  %vm1229_vm4 = vcmask 80896  }
 0xe76   :  { %v1599_v55 = vadd.f32 %v1598_v43, %v1597_v51  ;;  %v1606_v44 = vrot.slane %v1605_v54, 4 }
 0xe78   :  { %v1600_v11 = vrot.slane %v1599_v55, 2  ;;  %v1607_v13 = vadd.f32 %v1606_v44, %v1605_v54 }
 0xe7a   :  { %v1601_v23 = vadd.f32 %v1600_v11, %v1599_v55  ;;  %v1608_v45 = vrot.slane %v1607_v13, 2 }
 0xe7c   :  { %v1602_v56 = vrot.slane %v1601_v23, 1  ;;  %v1609_v47 = vadd.f32 %v1608_v45, %v1607_v13 }
 0xe7e   :  { %v1603_v24 = vadd.f32 %v1602_v56, %v1601_v23  ;;  %v1610_v25 = vrot.slane %v1609_v47, 1 }
 0xe80   :  { %v1611_v26 = vadd.f32 %v1610_v25, %v1609_v47  ;;  %v1612_v15 = vmul.f32 %v1603_v24, %v1603_v24 }
 0xe82   :  { %v1613_v16 = vsub.f32 %v1611_v26, %v1612_v15 }
 0xe84   :  { %v1614_v46 = vmax.f32 %v1613_v16, 1e-08 }
 0xe86   :  { %2168 = vrsqrt.f32 %v1614_v46  ;;  %vm1617_vm1 = vcmp.eq.f32.partialorder %v1614_v46, inf  ;;  %v1620_v19 = vand.u32 2147483648, %v1614_v46  ;;  %vm1619_vm3 = vcmp.eq.f32.partialorder %v1614_v46, 0.0 }
 0xe90   :  { %v2169_v17 = vpop.eup %2168 }
 0xe91   :  { %v1616_v18 = vmul.f32 %v2169_v17, %v1614_v46 }
 0xe93   :  { %v1618_v20 = vsel %vm1617_vm1, %v1614_v46, %v1616_v18 }
 0xe94   :  { %v1621_v21 = vsel %vm1619_vm3, %v1620_v19, %v1618_v20 }
 0xe95   :  { %1623 = vrot.lane.b32.xlu1 %v1621_v21, %s2173_s3 }
 0xe99   :  { %1226 = vrot.lane.b32.xlu1 %v2820_v36, %s2176_s14  ;;  %v1162_v36 = vld [vmem:[%s2934_s16] sm:$0x1] }
 0xe9a   :  { %v1220_v4 = vadd.f32 %v2863_v41, %v1162_v36 }
 0xf07   :  { %v1624_v34 = vpop.permute.xlu1 %1623 }
 0xf08   :  { %v1626_v59 = vsel %vm518_vm13, %v1603_v24, %v1624_v34 }
 0xf09   :  { %v1627_v57 = vpack.c.bf16 %v1626_v59, %v1626_v59 }
 0xf0b   :  { %2032 = vmatmul.mubr.msk.bf16.vlgmr.msra.gmra.mrb[28].mxu0 %vm520_vm15, %v1627_v57  ;;  %v1227_v3 = vpop.permute.xlu1 %1226 }
 0xf0c   :  { %v1230_v52 = vsel %vm1229_vm4, %v1220_v4, %v1227_v3 }
 0xf0d   :  { %v1232_v6 = vsel %vm1231_vm9, %v1230_v52, 0.0 }
 0xfde   :  { %v1665_v2 = vpop.f32.mrb[28].mxu0 }
 0xfdf   :  { %v1666_v12 = vadd.f32 %v1665_v2, %v2817_v22  ;;  %v2033_v28 = vpop.f32.mrb[29].mxu0 }
 0xfe0   :  { %v1668_v60 = vpop.f32.mrb[30].mxu0 }
 0xfe1   :  { %v1671_v61 = vpack.c.bf16 %v1666_v12, %v1666_v12  ;;  %1716 = vrot.lane.b32.xlu0 %v1666_v12, %s2176_s14  ;;  %v2034_v62 = vpop.f32.mrb[31].mxu0 }
 0xfe3   :  { %2042 = vmatmul.mubr.msk.bf16.vlgmr.msra.gmra.mrb[28].mxu1 %vm1181_vm8, %v1671_v61 }
0x1053   :  { %v1717_v40 = vpop.permute.xlu0 %1716 }
0x10b6   :  { %v1709_v29 = vpop.f32.mrb[28].mxu1 }
0x10b7   :  { %v1710_v27 = vadd.f32 %v1709_v29, %v1162_v36  ;;  %v2043_v39 = vpop.f32.mrb[29].mxu1 }
0x10b8   :  { %v1712_v22 = vpop.f32.mrb[30].mxu1 }
0x10b9   :  { %v1719_v5 = vsel %vm1229_vm4, %v1710_v27, %v1717_v40  ;;  %v2044_v58 = vpop.f32.mrb[31].mxu1 }
0x10ba   :  { %v1720_v30 = vsel %vm1231_vm9, %v1719_v5, 0.0 }
0x10bb   :  { %v1722_v0 = vrot.slane %v1720_v30, 7 }
0x10bd   :  { %v1724_v31 = vsel %vm491_vm5, %v1232_v6, %v1722_v0 }
0x10be   :  { %1725 = vst [vmem:[%s2935_s17] sm:$0x3] %v1724_v31 }

</bundles_post_ra>
